<compile_context>
chip_gen: v6e
topology: v6e:2x2x1
jax: 0.10.0
libtpu: 0.0.40
codegen_flags: <defaults>
</compile_context>

<pallas_src>
import math

import jax
import jax.numpy as jnp
from jax.experimental import pallas as pl
from jax.experimental.pallas import tpu as pltpu

LANE = 128      # vreg lane width
SUBLANE = 8     # f32 sublane count


def _round_up(n, m):
    return ((n + m - 1) // m) * m


def _pad2d(a, rows, cols):
    r, c = a.shape
    if r == rows and c == cols:
        return a
    return jnp.pad(a, ((0, rows - r), (0, cols - c)))


def _vmem_capacity_bytes():
    """Per-core VMEM capacity; conservative (v7x-sized) fallback if unknown."""
    try:
        cap = getattr(pltpu.get_tpu_info(), "vmem_capacity_bytes", None)
        if cap:
            return int(cap)
    except Exception:
        pass
    return 64 << 20


def _dqn_mlp_kernel(x_ref, w1_ref, b1_ref, w2_ref, b2_ref, w3_ref, b3_ref,
                    out_ref):
    # Layer 1: Linear + ReLU.  x arrives already in the matmul dtype, so the
    # MXU consumes it directly; accumulation and elementwise ops are f32.
    h1 = jnp.dot(x_ref[...], w1_ref[...], preferred_element_type=jnp.float32)
    h1 = jnp.maximum(h1 + b1_ref[...], 0.0)

    # Layer 2: Linear + ReLU.
    h2 = jnp.dot(h1.astype(w2_ref.dtype), w2_ref[...],
                 preferred_element_type=jnp.float32)
    h2 = jnp.maximum(h2 + b2_ref[...], 0.0)

    # Layer 3: Linear (Q-value head); lane-dense padded store in out dtype.
    q = jnp.dot(h2.astype(w3_ref.dtype), w3_ref[...],
                preferred_element_type=jnp.float32)
    out_ref[...] = (q + b3_ref[...]).astype(out_ref.dtype)


def dqn_forward(x, params, *, tile_b=None, matmul_dtype=jnp.bfloat16,
                out_dtype=jnp.float32):
    """Fused DQN MLP forward.

    x: (B, state_dim) f32.  params = (w1, b1, w2, b2, w3, b3) with weights
    stored as (in_features, out_features).  Returns (B, n_actions) out_dtype.
    """
    w1, b1, w2, b2, w3, b3 = params
    B, D = x.shape
    H1, H2, A = w1.shape[1], w2.shape[1], w3.shape[1]

    # Lane-pad only the *output* dims of each layer to 128 (zero padding keeps
    # real outputs exact).  The layer-1 contraction dim stays at the true
    # state_dim so the pipelined x stream carries no padded bytes.
    H1p, H2p, Ap = (_round_up(d, LANE) for d in (H1, H2, A))

    itm = jnp.dtype(matmul_dtype).itemsize
    oitm = jnp.dtype(out_dtype).itemsize
    # Row alignment: sublane-tile granularity of the narrowest dtype in play
    # (8 rows for f32, 16 for bf16 packing).
    row_align = SUBLANE * max(1, 4 // itm, 4 // oitm)

    # ---- generation-aware VMEM budget -------------------------------------
    vmem_cap = _vmem_capacity_bytes()
    headroom = max(8 << 20, vmem_cap // 8)        # compiler scratch etc.
    budget = vmem_cap - headroom

    # Resident weight/bias bytes (worst case: double-buffered if Buffered(1)
    # is not honoured by this JAX build).
    Dr = _round_up(D, 16)
    res_bytes = ((Dr * H1p + H1p * H2p + H2p * Ap) * itm
                 + (H1p + H2p + Ap) * 4)
    # Per batch-row VMEM: double-buffered x / out tiles (x's last dim rounds
    # up to a full 128-lane vreg in VMEM layout), f32 + matmul-dtype copies of
    # h1/h2, and the f32 q accumulator.
    per_row = (2 * _round_up(D, LANE) * itm
               + 2 * Ap * oitm
               + (H1p + H2p) * (4 + itm)
               + Ap * 4)

    if tile_b is None:
        avail = budget - 2 * res_bytes
        rows_cap = (avail // per_row) if avail > 0 else row_align
        rows_cap = max(row_align, (rows_cap // row_align) * row_align)
        # Big tiles on the 128 MiB parts (fewer ~0.35us grid steps); moderate
        # on 64 MiB v7x.
        soft_cap = 2048 if vmem_cap > (64 << 20) else 1024
        tile_b = min(_round_up(B, row_align), soft_cap, rows_cap)
        if vmem_cap <= (64 << 20):
            # v7x has two TensorCores: keep at least 2 grid steps so the
            # "parallel" batch axis can feed both cores.
            half = _round_up(pl.cdiv(_round_up(B, row_align), 2), row_align)
            tile_b = min(tile_b, max(row_align, half))
    tile_b = _round_up(max(int(tile_b), row_align), row_align)
    Bp = _round_up(B, tile_b)
    grid = (Bp // tile_b,)

    footprint = 2 * res_bytes + tile_b * per_row
    vmem_limit = int(min(budget, max(32 << 20, 2 * footprint)))
    vmem_limit = max(vmem_limit, 16 << 20)
    # TODO(synk): if the resident weights alone exceed the VMEM budget
    # (e.g. hidden >= ~4096 bf16 on v7x), a hidden-tiled variant (grid axis
    # over the hidden dim with a pl.when-initialized f32 accumulator) is
    # required instead of fully-resident weights; not implemented here.

    # ---- operand packing ---------------------------------------------------
    # x: cast to the matmul dtype (bf16 halves the dominant HBM->VMEM stream);
    # pad the batch only when needed — XLA fuses cast+pad into one pass that
    # writes bf16 bytes, and for aligned batches it is a single convert.
    x_in = x.astype(matmul_dtype)
    if Bp != B:
        x_in = jnp.pad(x_in, ((0, Bp - B), (0, 0)))

    w1_p = _pad2d(w1, D, H1p).astype(matmul_dtype)
    w2_p = _pad2d(w2, H1p, H2p).astype(matmul_dtype)
    w3_p = _pad2d(w3, H2p, Ap).astype(matmul_dtype)
    b1_p = _pad2d(b1.reshape(1, -1), 1, H1p).astype(jnp.float32)
    b2_p = _pad2d(b2.reshape(1, -1), 1, H2p).astype(jnp.float32)
    b3_p = _pad2d(b3.reshape(1, -1), 1, Ap).astype(jnp.float32)
    residents = (w1_p, b1_p, w2_p, b2_p, w3_p, b3_p)

    def _call(single_buffer_residents):
        def resident_spec(a):
            if single_buffer_residents:
                # Constant block index -> single buffer halves resident VMEM.
                return pl.BlockSpec(a.shape, lambda i: (0, 0),
                                    pipeline_mode=pl.Buffered(1))
            return pl.BlockSpec(a.shape, lambda i: (0, 0))

        return pl.pallas_call(
            _dqn_mlp_kernel,
            out_shape=jax.ShapeDtypeStruct((Bp, Ap), out_dtype),
            grid_spec=pltpu.PrefetchScalarGridSpec(
                num_scalar_prefetch=0,
                grid=grid,
                in_specs=[pl.BlockSpec((tile_b, D), lambda i: (i, 0))]
                + [resident_spec(a) for a in residents],
                out_specs=pl.BlockSpec((tile_b, Ap), lambda i: (i, 0)),
            ),
            compiler_params=pltpu.CompilerParams(
                dimension_semantics=("parallel",),
                vmem_limit_bytes=vmem_limit,
            ),
        )(x_in, *residents)

    try:
        out_p = _call(True)     # single-buffered resident weights/biases
    except Exception:           # pipeline_mode not honoured -> default 2-deep
        out_p = _call(False)

    # Strip batch / lane padding to recover the module's output shape.
    return out_p[:B, :A]


def init_params(key, state_dim, hidden, n_actions):
    """Deterministic init mimicking torch.nn.Linear's default
    U(-1/sqrt(fan_in), 1/sqrt(fan_in)).  Weights returned as (in, out)."""
    def linear(k, fan_in, fan_out):
        kw, kb = jax.random.split(k)
        bound = 1.0 / math.sqrt(fan_in)
        w = jax.random.uniform(kw, (fan_in, fan_out), jnp.float32,
                               minval=-bound, maxval=bound)
        b = jax.random.uniform(kb, (1, fan_out), jnp.float32,
                               minval=-bound, maxval=bound)
        return w, b

    k1, k2, k3 = jax.random.split(key, 3)
    w1, b1 = linear(k1, state_dim, hidden)
    w2, b2 = linear(k2, hidden, hidden)
    w3, b3 = linear(k3, hidden, n_actions)
    return (w1, b1, w2, b2, w3, b3)


def dqn_forward_ref(x, params):
    """Pure-JAX reference for correctness check."""
    w1, b1, w2, b2, w3, b3 = params
    h = jnp.maximum(x @ w1 + b1, 0.0)
    h = jnp.maximum(h @ w2 + b2, 0.0)
    return h @ w3 + b3


if __name__ == "__main__":
    key = jax.random.PRNGKey(0)
    k_params, k_x = jax.random.split(key)

    # Batched replay-buffer-style evaluation (B=256); feature dims stay tiny
    # and only layer outputs are lane-padded internally.
    batch, state_dim, hidden, n_actions = 256, 16, 32, 4
    params = init_params(k_params, state_dim, hidden, n_actions)
    x = jax.random.normal(k_x, (batch, state_dim), jnp.float32)

    q_ref = dqn_forward_ref(x, params)

    # Tight correctness check: f32 MXU operands, f32 output.
    q_f32 = dqn_forward(x, params, matmul_dtype=jnp.float32,
                        out_dtype=jnp.float32)
    jax.block_until_ready(q_f32)
    assert q_f32.shape == (batch, n_actions)
    assert jnp.allclose(q_f32, q_ref, atol=1e-5, rtol=1e-5)

    # Fast path: bf16 activations/weights on the MXU, f32 accumulation and
    # elementwise, bf16 Q-value writeback.  (bf16 between layers / at the
    # output can shift ties in argmax-based action selection vs f32.)
    q = dqn_forward(x, params, out_dtype=jnp.bfloat16)
    jax.block_until_ready(q)
    assert q.shape == (batch, n_actions)
    assert jnp.allclose(q.astype(jnp.float32), q_ref, atol=5e-2, rtol=5e-2)

    print("KERNEL_OK")
</pallas_src>

<mosaic_0001>
module attributes {stable_mosaic.version = 11 : i64} {
  func.func @_dqn_mlp_kernel(%arg0: i32, %arg1: memref<128x16xf32, #tpu.memory_space<vmem>>, %arg2: memref<16x128xf32, #tpu.memory_space<vmem>>, %arg3: memref<1x128xf32, #tpu.memory_space<vmem>>, %arg4: memref<128x128xf32, #tpu.memory_space<vmem>>, %arg5: memref<1x128xf32, #tpu.memory_space<vmem>>, %arg6: memref<128x128xf32, #tpu.memory_space<vmem>>, %arg7: memref<1x128xf32, #tpu.memory_space<vmem>>, %arg8: memref<128x128xf32, #tpu.memory_space<vmem>>) attributes {dimension_semantics = [#tpu.dimension_semantics<parallel>], iteration_bounds = array<i64: 2>, scalar_prefetch = 0 : i64, scratch_operands = 0 : i64, tpu.core_type = #tpu.core_type<tc>, window_params = [{transform_indices = @transform_0, window_bounds = array<i64: 128, 16>}, {pipeline_mode = #tpu.pipeline_mode<synchronous>, transform_indices = @transform_1, window_bounds = array<i64: 16, 128>}, {pipeline_mode = #tpu.pipeline_mode<synchronous>, transform_indices = @transform_2, window_bounds = array<i64: 1, 128>}, {pipeline_mode = #tpu.pipeline_mode<synchronous>, transform_indices = @transform_3, window_bounds = array<i64: 128, 128>}, {pipeline_mode = #tpu.pipeline_mode<synchronous>, transform_indices = @transform_4, window_bounds = array<i64: 1, 128>}, {pipeline_mode = #tpu.pipeline_mode<synchronous>, transform_indices = @transform_5, window_bounds = array<i64: 128, 128>}, {pipeline_mode = #tpu.pipeline_mode<synchronous>, transform_indices = @transform_6, window_bounds = array<i64: 1, 128>}, {transform_indices = @transform_7, window_bounds = array<i64: 128, 128>}]} {
    %c0 = arith.constant 0 : index
    %c0_0 = arith.constant 0 : index
    %0 = vector.load %arg1[%c0, %c0_0] : memref<128x16xf32, #tpu.memory_space<vmem>>, vector<128x16xf32>
    %c0_1 = arith.constant 0 : index
    %c0_2 = arith.constant 0 : index
    %1 = vector.load %arg2[%c0_1, %c0_2] : memref<16x128xf32, #tpu.memory_space<vmem>>, vector<16x128xf32>
    %cst = arith.constant dense<0.000000e+00> : vector<128x128xf32>
    %2 = tpu.matmul %0, %1, %cst {dimension_numbers = #tpu.dot_dimension_numbers<[1], [0], [0], [1], [0, 0, 1, 1], [], []>} : vector<128x16xf32>, vector<16x128xf32>, vector<128x128xf32> -> vector<128x128xf32>
    %c0_3 = arith.constant 0 : index
    %c0_4 = arith.constant 0 : index
    %3 = vector.load %arg3[%c0_3, %c0_4] : memref<1x128xf32, #tpu.memory_space<vmem>>, vector<1x128xf32>
    %4 = vector.broadcast %3 : vector<1x128xf32> to vector<128x128xf32>
    %5 = arith.addf %2, %4 : vector<128x128xf32>
    %cst_5 = arith.constant 0.000000e+00 : f32
    %6 = vector.broadcast %cst_5 : f32 to vector<128x128xf32>
    %7 = arith.maximumf %5, %6 : vector<128x128xf32>
    %c0_6 = arith.constant 0 : index
    %c0_7 = arith.constant 0 : index
    %8 = vector.load %arg4[%c0_6, %c0_7] : memref<128x128xf32, #tpu.memory_space<vmem>>, vector<128x128xf32>
    %cst_8 = arith.constant dense<0.000000e+00> : vector<128x128xf32>
    %9 = tpu.matmul %7, %8, %cst_8 {dimension_numbers = #tpu.dot_dimension_numbers<[1], [0], [0], [1], [0, 0, 1, 1], [], []>} : vector<128x128xf32>, vector<128x128xf32>, vector<128x128xf32> -> vector<128x128xf32>
    %c0_9 = arith.constant 0 : index
    %c0_10 = arith.constant 0 : index
    %10 = vector.load %arg5[%c0_9, %c0_10] : memref<1x128xf32, #tpu.memory_space<vmem>>, vector<1x128xf32>
    %11 = vector.broadcast %10 : vector<1x128xf32> to vector<128x128xf32>
    %12 = arith.addf %9, %11 : vector<128x128xf32>
    %cst_11 = arith.constant 0.000000e+00 : f32
    %13 = vector.broadcast %cst_11 : f32 to vector<128x128xf32>
    %14 = arith.maximumf %12, %13 : vector<128x128xf32>
    %c0_12 = arith.constant 0 : index
    %c0_13 = arith.constant 0 : index
    %15 = vector.load %arg6[%c0_12, %c0_13] : memref<128x128xf32, #tpu.memory_space<vmem>>, vector<128x128xf32>
    %cst_14 = arith.constant dense<0.000000e+00> : vector<128x128xf32>
    %16 = tpu.matmul %14, %15, %cst_14 {dimension_numbers = #tpu.dot_dimension_numbers<[1], [0], [0], [1], [0, 0, 1, 1], [], []>} : vector<128x128xf32>, vector<128x128xf32>, vector<128x128xf32> -> vector<128x128xf32>
    %c0_15 = arith.constant 0 : index
    %c0_16 = arith.constant 0 : index
    %17 = vector.load %arg7[%c0_15, %c0_16] : memref<1x128xf32, #tpu.memory_space<vmem>>, vector<1x128xf32>
    %18 = vector.broadcast %17 : vector<1x128xf32> to vector<128x128xf32>
    %19 = arith.addf %16, %18 : vector<128x128xf32>
    %c0_17 = arith.constant 0 : index
    %c0_18 = arith.constant 0 : index
    %20 = vector.load %arg8[%c0_17, %c0_18] : memref<128x128xf32, #tpu.memory_space<vmem>>, vector<128x128xf32>
    tpu.vector_store %arg8[%c0_17, %c0_18], %19 {strides = array<i32>} : memref<128x128xf32, #tpu.memory_space<vmem>>, vector<128x128xf32>,
    return
  }
  func.func @transform_0(%arg0: i32) -> (i32, i32) {
    %c0_i32 = arith.constant 0 : i32
    %c0_i32_0 = arith.constant 0 : i32
    return %arg0, %c0_i32 : i32, i32
  }
  func.func @transform_1(%arg0: i32) -> (i32, i32) {
    %c0_i32 = arith.constant 0 : i32
    %c0_i32_0 = arith.constant 0 : i32
    %c0_i32_1 = arith.constant 0 : i32
    return %c0_i32, %c0_i32_0 : i32, i32
  }
  func.func @transform_2(%arg0: i32) -> (i32, i32) {
    %c0_i32 = arith.constant 0 : i32
    %c0_i32_0 = arith.constant 0 : i32
    %c0_i32_1 = arith.constant 0 : i32
    return %c0_i32, %c0_i32_0 : i32, i32
  }
  func.func @transform_3(%arg0: i32) -> (i32, i32) {
    %c0_i32 = arith.constant 0 : i32
    %c0_i32_0 = arith.constant 0 : i32
    %c0_i32_1 = arith.constant 0 : i32
    return %c0_i32, %c0_i32_0 : i32, i32
  }
  func.func @transform_4(%arg0: i32) -> (i32, i32) {
    %c0_i32 = arith.constant 0 : i32
    %c0_i32_0 = arith.constant 0 : i32
    %c0_i32_1 = arith.constant 0 : i32
    return %c0_i32, %c0_i32_0 : i32, i32
  }
  func.func @transform_5(%arg0: i32) -> (i32, i32) {
    %c0_i32 = arith.constant 0 : i32
    %c0_i32_0 = arith.constant 0 : i32
    %c0_i32_1 = arith.constant 0 : i32
    return %c0_i32, %c0_i32_0 : i32, i32
  }
  func.func @transform_6(%arg0: i32) -> (i32, i32) {
    %c0_i32 = arith.constant 0 : i32
    %c0_i32_0 = arith.constant 0 : i32
    %c0_i32_1 = arith.constant 0 : i32
    return %c0_i32, %c0_i32_0 : i32, i32
  }
  func.func @transform_7(%arg0: i32) -> (i32, i32) {
    %c0_i32 = arith.constant 0 : i32
    %c0_i32_0 = arith.constant 0 : i32
    return %arg0, %c0_i32 : i32, i32
  }
}

module attributes {stable_mosaic.version = 11 : i64} {
  func.func @_dqn_mlp_kernel(%arg0: i32, %arg1: memref<128x16xf32, #tpu.memory_space<vmem>>, %arg2: memref<16x128xf32, #tpu.memory_space<vmem>>, %arg3: memref<1x128xf32, #tpu.memory_space<vmem>>, %arg4: memref<128x128xf32, #tpu.memory_space<vmem>>, %arg5: memref<1x128xf32, #tpu.memory_space<vmem>>, %arg6: memref<128x128xf32, #tpu.memory_space<vmem>>, %arg7: memref<1x128xf32, #tpu.memory_space<vmem>>, %arg8: memref<128x128xf32, #tpu.memory_space<vmem>>) attributes {dimension_semantics = [#tpu.dimension_semantics<parallel>], iteration_bounds = array<i64: 2>, scalar_prefetch = 0 : i64, scratch_operands = 0 : i64, tpu.core_type = #tpu.core_type<tc>, window_params = [{transform_indices = @transform_0, window_bounds = array<i64: 128, 16>}, {pipeline_mode = #tpu.pipeline_mode<synchronous>, transform_indices = @transform_1, window_bounds = array<i64: 16, 128>}, {pipeline_mode = #tpu.pipeline_mode<synchronous>, transform_indices = @transform_2, window_bounds = array<i64: 1, 128>}, {pipeline_mode = #tpu.pipeline_mode<synchronous>, transform_indices = @transform_3, window_bounds = array<i64: 128, 128>}, {pipeline_mode = #tpu.pipeline_mode<synchronous>, transform_indices = @transform_4, window_bounds = array<i64: 1, 128>}, {pipeline_mode = #tpu.pipeline_mode<synchronous>, transform_indices = @transform_5, window_bounds = array<i64: 128, 128>}, {pipeline_mode = #tpu.pipeline_mode<synchronous>, transform_indices = @transform_6, window_bounds = array<i64: 1, 128>}, {transform_indices = @transform_7, window_bounds = array<i64: 128, 128>}]} {
    %c0 = arith.constant 0 : index
    %c0_0 = arith.constant 0 : index
    %0 = vector.load %arg1[%c0, %c0_0] : memref<128x16xf32, #tpu.memory_space<vmem>>, vector<128x16xf32>
    %c0_1 = arith.constant 0 : index
    %c0_2 = arith.constant 0 : index
    %1 = vector.load %arg2[%c0_1, %c0_2] : memref<16x128xf32, #tpu.memory_space<vmem>>, vector<16x128xf32>
    %cst = arith.constant dense<0.000000e+00> : vector<128x128xf32>
    %2 = tpu.matmul %0, %1, %cst {dimension_numbers = #tpu.dot_dimension_numbers<[1], [0], [0], [1], [0, 0, 1, 1], [], []>} : vector<128x16xf32>, vector<16x128xf32>, vector<128x128xf32> -> vector<128x128xf32>
    %c0_3 = arith.constant 0 : index
    %c0_4 = arith.constant 0 : index
    %3 = vector.load %arg3[%c0_3, %c0_4] : memref<1x128xf32, #tpu.memory_space<vmem>>, vector<1x128xf32>
    %4 = vector.broadcast %3 : vector<1x128xf32> to vector<128x128xf32>
    %5 = arith.addf %2, %4 : vector<128x128xf32>
    %cst_5 = arith.constant 0.000000e+00 : f32
    %6 = vector.broadcast %cst_5 : f32 to vector<128x128xf32>
    %7 = arith.maximumf %5, %6 : vector<128x128xf32>
    %c0_6 = arith.constant 0 : index
    %c0_7 = arith.constant 0 : index
    %8 = vector.load %arg4[%c0_6, %c0_7] : memref<128x128xf32, #tpu.memory_space<vmem>>, vector<128x128xf32>
    %cst_8 = arith.constant dense<0.000000e+00> : vector<128x128xf32>
    %9 = tpu.matmul %7, %8, %cst_8 {dimension_numbers = #tpu.dot_dimension_numbers<[1], [0], [0], [1], [0, 0, 1, 1], [], []>} : vector<128x128xf32>, vector<128x128xf32>, vector<128x128xf32> -> vector<128x128xf32>
    %c0_9 = arith.constant 0 : index
    %c0_10 = arith.constant 0 : index
    %10 = vector.load %arg5[%c0_9, %c0_10] : memref<1x128xf32, #tpu.memory_space<vmem>>, vector<1x128xf32>
    %11 = vector.broadcast %10 : vector<1x128xf32> to vector<128x128xf32>
    %12 = arith.addf %9, %11 : vector<128x128xf32>
    %cst_11 = arith.constant 0.000000e+00 : f32
    %13 = vector.broadcast %cst_11 : f32 to vector<128x128xf32>
    %14 = arith.maximumf %12, %13 : vector<128x128xf32>
    %c0_12 = arith.constant 0 : index
    %c0_13 = arith.constant 0 : index
    %15 = vector.load %arg6[%c0_12, %c0_13] : memref<128x128xf32, #tpu.memory_space<vmem>>, vector<128x128xf32>
    %cst_14 = arith.constant dense<0.000000e+00> : vector<128x128xf32>
    %16 = tpu.matmul %14, %15, %cst_14 {dimension_numbers = #tpu.dot_dimension_numbers<[1], [0], [0], [1], [0, 0, 1, 1], [], []>} : vector<128x128xf32>, vector<128x128xf32>, vector<128x128xf32> -> vector<128x128xf32>
    %c0_15 = arith.constant 0 : index
    %c0_16 = arith.constant 0 : index
    %17 = vector.load %arg7[%c0_15, %c0_16] : memref<1x128xf32, #tpu.memory_space<vmem>>, vector<1x128xf32>
    %18 = vector.broadcast %17 : vector<1x128xf32> to vector<128x128xf32>
    %19 = arith.addf %16, %18 : vector<128x128xf32>
    %c0_17 = arith.constant 0 : index
    %c0_18 = arith.constant 0 : index
    %20 = vector.load %arg8[%c0_17, %c0_18] : memref<128x128xf32, #tpu.memory_space<vmem>>, vector<128x128xf32>
    tpu.vector_store %arg8[%c0_17, %c0_18], %19 {strides = array<i32>} : memref<128x128xf32, #tpu.memory_space<vmem>>, vector<128x128xf32>,
    return
  }
  func.func @transform_0(%arg0: i32) -> (i32, i32) {
    %c0_i32 = arith.constant 0 : i32
    %c0_i32_0 = arith.constant 0 : i32
    return %arg0, %c0_i32 : i32, i32
  }
  func.func @transform_1(%arg0: i32) -> (i32, i32) {
    %c0_i32 = arith.constant 0 : i32
    %c0_i32_0 = arith.constant 0 : i32
    %c0_i32_1 = arith.constant 0 : i32
    return %c0_i32, %c0_i32_0 : i32, i32
  }
  func.func @transform_2(%arg0: i32) -> (i32, i32) {
    %c0_i32 = arith.constant 0 : i32
    %c0_i32_0 = arith.constant 0 : i32
    %c0_i32_1 = arith.constant 0 : i32
    return %c0_i32, %c0_i32_0 : i32, i32
  }
  func.func @transform_3(%arg0: i32) -> (i32, i32) {
    %c0_i32 = arith.constant 0 : i32
    %c0_i32_0 = arith.constant 0 : i32
    %c0_i32_1 = arith.constant 0 : i32
    return %c0_i32, %c0_i32_0 : i32, i32
  }
  func.func @transform_4(%arg0: i32) -> (i32, i32) {
    %c0_i32 = arith.constant 0 : i32
    %c0_i32_0 = arith.constant 0 : i32
    %c0_i32_1 = arith.constant 0 : i32
    return %c0_i32, %c0_i32_0 : i32, i32
  }
  func.func @transform_5(%arg0: i32) -> (i32, i32) {
    %c0_i32 = arith.constant 0 : i32
    %c0_i32_0 = arith.constant 0 : i32
    %c0_i32_1 = arith.constant 0 : i32
    return %c0_i32, %c0_i32_0 : i32, i32
  }
  func.func @transform_6(%arg0: i32) -> (i32, i32) {
    %c0_i32 = arith.constant 0 : i32
    %c0_i32_0 = arith.constant 0 : i32
    %c0_i32_1 = arith.constant 0 : i32
    return %c0_i32, %c0_i32_0 : i32, i32
  }
  func.func @transform_7(%arg0: i32) -> (i32, i32) {
    %c0_i32 = arith.constant 0 : i32
    %c0_i32_0 = arith.constant 0 : i32
    return %arg0, %c0_i32 : i32, i32
  }
}

</mosaic_0001>

<bundles_post_ra>
// kernel: tpu_custom_call.1
= control target key start
LH: loop header
LB: loop body
LE: loop exit
PB: predicated region body
PF: predicated region fallthrough
CT: control target
= control target key end

     0   :  { %12 = vsyncpa [#allocation3], 0  ;;  %s1628_s0 = inlined_call_operand.vmem [shape: f32[256,16], index: 0, kind: input, shape index: {}]   ;;  %s1629_s1 = inlined_call_operand.vmem [shape: f32[16,128], index: 1, kind: input, shape index: {}]   ;;  %s1630_s2 = inlined_call_operand.vmem [shape: f32[1,128], index: 2, kind: input, shape index: {}]   ;;  %s1631_s3 = inlined_call_operand.vmem [shape: f32[128,128], index: 3, kind: input, shape index: {}]   ;;  %s1632_s4 = inlined_call_operand.vmem [shape: f32[1,128], index: 4, kind: input, shape index: {}]   ;;  %s1633_s5 = inlined_call_operand.vmem [shape: f32[128,128], index: 5, kind: input, shape index: {}]   ;;  %s1634_s6 = inlined_call_operand.vmem [shape: f32[1,128], index: 6, kind: input, shape index: {}]   ;;  %s1635_s7 = inlined_call_operand.hbm [shape: f32[256,128], index: 7, kind: output, shape index: {}]  }
   0x1   :  { %14 = vsyncpa [#allocation3 + $0x1], 0  ;;  %s1359_s24 = smov 0   ;;  %s1361_s25 = smov 0  }
   0x2   :  { %s1363_s26 = smov 0   ;;  %s1365_s27 = smov 0  }
   0x3 LB: > { %s1380_s28 = sadd.s32 4294967295, %s1314_s27   ;;  %s959_s29 = sadd.s32 4294967294, %s1314_s27   ;;  %s1314_s27 = sphi %s1365_s27, %s1641_s27   ;;  %s1310_s26 = sphi %s1363_s26, %s1640_s26   ;;  %s1306_s25 = sphi %s1361_s25, %s1639_s25   ;;  %s1302_s24 = sphi %s1359_s24, %s1638_s24  }
   0x4   : > { %s1384_s30 = sadd.s32 1, %s1314_s27   ;;  %s179_s8 = sadd.s32 1, %s1310_s26 }
   0x5   : > { %s176_s9 = ssub.s32 %s1314_s27, %s1384_s30  ;;  %p189_p0 = scmp.ne.s32.totalorder %s1310_s26, %s1306_s25 }
   0x6   : > { %p177_p1 = scmp.eq.s32.totalorder %s176_s9, 0  ;;  %p190_p2 = scmp.eq.s32.totalorder %s1380_s28, 1 }
   0x7   : > { %p195_p3 = scmp.ne.s32.totalorder %s1306_s25, %s1302_s24  ;;  %p196_p4 = scmp.eq.s32.totalorder %s959_s29, 1 }
   0x8   : > { %s1395_s10 = scalar_select %p177_p1, %s1310_s26, %s179_s8  }
   0x9   : > { %p1397_p5 = por %p190_p2, %p189_p0  ;;  %p1401_p6 = por %p196_p4, %p195_p3 }
   0xa   : > { %p962_p7 = scmp.ge.s32.totalorder %s1314_s27, 1  ;;  %p241_p8 = scmp.lt.s32.totalorder %s1314_s27, 3 }
   0xc   : > { %p242_p9 = pnand %p962_p7, %p241_p8 }
   0xd   : > { %s964_s17 = sshll.u32 (!%p242_p9), %s1380_s28, 4  ;;  %s270_s21 = sand.u32 (!%p242_p9), 1, %s1306_s25  }
   0xe   : > { %245 = sbr.rel (%p242_p9) target bundleno = 664 (0x298), region = 48  ;;  %p274_p10 = scmp.lt.s32.totalorder (!%p242_p9), %s964_s17, 31 }
   0xf   : > { %s963_s22 = sshll.u32 (!%p242_p9), %s270_s21, 7  ;;  %s990_s8 = sshll.u32 (!%p242_p9), %s1380_s28, 11 }
  0x10   : > { %s1580_s16 = scalar_lea.hbm (!%p242_p9), %s1635_s7, %s990_s8  ;;  %s1588_s28 = scalar_lea.sflag (!%p242_p9), [#allocation3], %s270_s21 }
  0x13   : > { %v297_v0 = vld [vmem:[%s1629_s1 + $0x8] sm:$0xff]  ;;  %v296_v1 = vld [vmem:[%s1629_s1] sm:$0xff]  ;;  %v530_v2 = vld [vmem:[%s1631_s3 + $0x78] sm:$0xff]  ;;  %s1643_s17 = smov (!%p274_p10, %s964_s17), 31  ;;  %vm305_vm0 = vcmask 130048  }
  0x14   : > { %1073 = vmatprep.subr.mxu0 %v297_v0  ;;  %1101 = vmatprep.subr.mxu1 %v530_v2  ;;  %v529_v3 = vld [vmem:[%s1631_s3 + $0x70] sm:$0xff]  ;;  %v528_v4 = vld [vmem:[%s1631_s3 + $0x68] sm:$0xff]  ;;  %v527_v5 = vld [vmem:[%s1631_s3 + $0x60] sm:$0xff]  ;;  %s965_s9 = sshll.u32 %s1643_s17, 3  ;;  %s1316_s17 = smov [#allocation2]  }
  0x15   : > { %1074 = vmatpush3.msra.mxu0 %v297_v0  ;;  %1102 = vmatpush3.msra.mxu1 %v530_v2  ;;  %s1429_s15 = scalar_lea.vmem %s1628_s0, %s965_s9  ;;  %v526_v6 = vld [vmem:[%s1631_s3 + $0x58] sm:$0xff]  ;;  %v525_v10 = vld [vmem:[%s1631_s3 + $0x50] sm:$0xff]  ;;  %v524_v12 = vld [vmem:[%s1631_s3 + $0x48] sm:$0xff]  ;;  %s1258_s19 = sshll.u32 %s1316_s17, 4  ;;  %s1259_s19 = int_to_ptr.vmem [resolvable:$false] %s1258_s19 }
  0x16   : > { %1075 = vmatprep.subr.mxu0 %v296_v1  ;;  %1103 = vmatprep.subr.mxu1 %v529_v3  ;;  %v280_v7 = vld [vmem:[%s1429_s15] sm:$0xff]  ;;  %v281_v8 = vld [vmem:[%s1429_s15 + $0x8] sm:$0xff]  ;;  %v282_v9 = vld [vmem:[%s1429_s15 + $0x10] sm:$0xff]  ;;  %s1260_s20 = scalar_lea.vmem %s1259_s19, 4096 }
  0x17   : > { %1076 = vmatpush3.msra.mxu0 %v296_v1  ;;  %1104 = vmatpush3.msra.mxu1 %v529_v3  ;;  %v283_v11 = vld [vmem:[%s1429_s15 + $0x18] sm:$0xff]  ;;  %v284_v13 = vld [vmem:[%s1429_s15 + $0x20] sm:$0xff]  ;;  %v285_v15 = vld [vmem:[%s1429_s15 + $0x28] sm:$0xff] }
  0x18   : > { %1105 = vmatprep.subr.mxu1 %v528_v4  ;;  %1077 = vmatprep.mubr.msk.f32.mxu0 %vm305_vm0, %v280_v7  ;;  %v523_v14 = vld [vmem:[%s1631_s3 + $0x40] sm:$0xff]  ;;  %v522_v16 = vld [vmem:[%s1631_s3 + $0x38] sm:$0xff]  ;;  %v286_v17 = vld [vmem:[%s1429_s15 + $0x30] sm:$0xff] }
  0x19   : > { %1106 = vmatpush3.msra.mxu1 %v528_v4  ;;  %1078 = vmatmul.mubr.msk.f32.vlgmr.msra.gmra.mxu0 %vm305_vm0, %v281_v8  ;;  %v521_v18 = vld [vmem:[%s1631_s3 + $0x30] sm:$0xff]  ;;  %v287_v19 = vld [vmem:[%s1429_s15 + $0x38] sm:$0xff]  ;;  %v520_v20 = vld [vmem:[%s1631_s3 + $0x28] sm:$0xff] }
  0x1a   : > { %1107 = vmatprep.subr.mxu1 %v527_v5  ;;  %1080 = vmatprep.mubr.msk.f32.mxu0 %vm305_vm0, %v282_v9  ;;  %v288_v21 = vld [vmem:[%s1429_s15 + $0x40] sm:$0xff]  ;;  %v289_v23 = vld [vmem:[%s1429_s15 + $0x48] sm:$0xff]  ;;  %v290_v24 = vld [vmem:[%s1429_s15 + $0x50] sm:$0xff] }
  0x1b   : > { %1108 = vmatpush3.msra.mxu1 %v527_v5  ;;  %v519_v22 = vld [vmem:[%s1631_s3 + $0x20] sm:$0xff]  ;;  %v291_v25 = vld [vmem:[%s1429_s15 + $0x58] sm:$0xff]  ;;  %v293_v27 = vld [vmem:[%s1429_s15 + $0x68] sm:$0xff] }
  0x1c   : > { %1109 = vmatprep.subr.mxu1 %v526_v6  ;;  %v292_v26 = vld [vmem:[%s1429_s15 + $0x60] sm:$0xff]  ;;  %v294_v28 = vld [vmem:[%s1429_s15 + $0x70] sm:$0xff]  ;;  %v295_v29 = vld [vmem:[%s1429_s15 + $0x78] sm:$0xff]  ;;  %s1559_s15 = scalar_lea.vmem [#allocation2], %s963_s22 }
  0x1d   : > { %1110 = vmatpush3.msra.mxu1 %v526_v6  ;;  %1081 = vmatmul.mubr.msk.f32.gmra.mxu0 %vm305_vm0, %v283_v11  ;;  %v518_v30 = vld [vmem:[%s1631_s3 + $0x18] sm:$0xff]  ;;  %v517_v31 = vld [vmem:[%s1631_s3 + $0x10] sm:$0xff]  ;;  %v516_v32 = vld [vmem:[%s1631_s3 + $0x8] sm:$0xff]  ;;  %s897_s9 = sshll.u32 %s1559_s15, 4  ;;  %s1582_s9 = int_to_ptr.vmem [resolvable:$true] %s897_s9 }
  0x1e   : > { %1111 = vmatprep.subr.mxu1 %v525_v10  ;;  %1083 = vmatprep.mubr.msk.f32.mxu0 %vm305_vm0, %v284_v13  ;;  %v515_v33 = vld [vmem:[%s1631_s3] sm:$0xff]  ;;  %v714_v34 = vld [vmem:[%s1633_s5 + $0x78] sm:$0xff]  ;;  %v713_v35 = vld [vmem:[%s1633_s5 + $0x70] sm:$0xff]  ;;  %s1254_s18 = scalar_lea.vmem %s1582_s9, 2048  ;;  %p1261_p0 = scmp.lt.s32.totalorder %s1582_s9, %s1259_s19 }
  0x1f   : > { %1112 = vmatpush3.msra.mxu1 %v525_v10  ;;  %1157 = vmatprep.subr.mxu0 %v714_v34  ;;  %v712_v36 = vld [vmem:[%s1633_s5 + $0x68] sm:$0xff]  ;;  %v711_v37 = vld [vmem:[%s1633_s5 + $0x60] sm:$0xff]  ;;  %v710_v38 = vld [vmem:[%s1633_s5 + $0x58] sm:$0xff]  ;;  %p1255_p11 = scmp.ne.s32.totalorder %s1582_s9, %s1254_s18  ;;  %p1262_p1 = scmp.lt.s32.totalorder %s1260_s20, %s1254_s18 }
  0x20   : > { %1113 = vmatprep.subr.mxu1 %v524_v12  ;;  %1158 = vmatpush3.msra.mxu0 %v714_v34  ;;  %v709_v39 = vld [vmem:[%s1633_s5 + $0x50] sm:$0xff]  ;;  %v708_v40 = vld [vmem:[%s1633_s5 + $0x48] sm:$0xff]  ;;  %v707_v41 = vld [vmem:[%s1633_s5 + $0x40] sm:$0xff] }
  0x21   : > { %1114 = vmatpush3.msra.mxu1 %v524_v12  ;;  %1084 = vmatmul.mubr.msk.f32.gmra.mxu0 %vm305_vm0, %v285_v15  ;;  %v706_v42 = vld [vmem:[%s1633_s5 + $0x38] sm:$0xff]  ;;  %v705_v43 = vld [vmem:[%s1633_s5 + $0x30] sm:$0xff]  ;;  %v704_v44 = vld [vmem:[%s1633_s5 + $0x28] sm:$0xff]  ;;  %p1256_p12 = pnand %p1255_p11, %p1397_p5  ;;  %p1263_p2 = por %p1262_p1, %p1261_p0 }
  0x22   : > { %1115 = vmatprep.subr.mxu1 %v523_v14  ;;  %1086 = vmatprep.mubr.msk.f32.mxu0 %vm305_vm0, %v286_v17  ;;  %v703_v45 = vld [vmem:[%s1633_s5 + $0x20] sm:$0xff]  ;;  %v702_v46 = vld [vmem:[%s1633_s5 + $0x18] sm:$0xff] }
  0x23   : > { %1116 = vmatpush3.msra.mxu1 %v523_v14  ;;  %1159 = vmatprep.subr.mxu0 %v713_v35  ;;  %v966_v47 = vld [vmem:[%s1630_s2] ss:$0 sm:$0xff]  ;;  %p1257_p13 = pneg %p1256_p12 }
  0x24   : > { %1117 = vmatprep.subr.mxu1 %v522_v16  ;;  %1160 = vmatpush3.msra.mxu0 %v713_v35  ;;  %v699_v34 = vld [vmem:[%s1633_s5] sm:$0xff] }
  0x25   : > { %1118 = vmatpush3.msra.mxu1 %v522_v16  ;;  %1087 = vmatmul.mubr.msk.f32.gmra.mxu0 %vm305_vm0, %v287_v19  ;;  %v983_v35 = vld [vmem:[%s1632_s4] ss:$0 sm:$0xff]  ;;  %p1264_p3 = pnand %p1263_p2, %p1257_p13 }
  0x26   : > { %1119 = vmatprep.subr.mxu1 %v521_v18  ;;  %1089 = vmatprep.mubr.msk.f32.mxu0 %vm305_vm0, %v288_v21 }
  0x27   : > { %1120 = vmatpush3.msra.mxu1 %v521_v18  ;;  %1161 = vmatprep.subr.mxu0 %v712_v36 }
  0x28   : > { %1121 = vmatprep.subr.mxu1 %v520_v20  ;;  %1162 = vmatpush3.msra.mxu0 %v712_v36 }
  0x29   : > { %1122 = vmatpush3.msra.mxu1 %v520_v20  ;;  %1090 = vmatmul.mubr.msk.f32.gmra.mxu0 %vm305_vm0, %v289_v23 }
  0x2a   : > { %1123 = vmatprep.subr.mxu1 %v519_v22  ;;  %1092 = vmatprep.mubr.msk.f32.mxu0 %vm305_vm0, %v290_v24 }
  0x2b   : > { %1124 = vmatpush3.msra.mxu1 %v519_v22  ;;  %1163 = vmatprep.subr.mxu0 %v711_v37 }
  0x2c   : > { %1125 = vmatprep.subr.mxu1 %v518_v30  ;;  %1164 = vmatpush3.msra.mxu0 %v711_v37 }
  0x2d   : > { %1093 = vmatmul.mubr.msk.f32.gmra.mxu0 %vm305_vm0, %v291_v25  ;;  %1126 = vmatpush3.msra.mxu1 %v518_v30 }
  0x2e   : > { %1095 = vmatprep.mubr.msk.f32.mxu0 %vm305_vm0, %v292_v26  ;;  %1127 = vmatprep.subr.mxu1 %v517_v31 }
  0x2f   : > { %1128 = vmatpush3.msra.mxu1 %v517_v31  ;;  %1165 = vmatprep.subr.mxu0 %v710_v38 }
  0x30   : > { %1129 = vmatprep.subr.mxu1 %v516_v32  ;;  %1166 = vmatpush3.msra.mxu0 %v710_v38 }
  0x31   : > { %1096 = vmatmul.mubr.msk.f32.gmra.mxu0 %vm305_vm0, %v293_v27  ;;  %1130 = vmatpush3.msra.mxu1 %v516_v32  ;;  %v701_v32 = vld [vmem:[%s1633_s5 + $0x10] sm:$0xff] }
  0x32   : > { %1098 = vmatprep.mubr.msk.f32.mxu0 %vm305_vm0, %v294_v28  ;;  %1131 = vmatprep.subr.mxu1 %v515_v33 }
  0x33   : > { %1132 = vmatpush3.msra.mxu1 %v515_v33  ;;  %1167 = vmatprep.subr.mxu0 %v709_v39  ;;  %v700_v33 = vld [vmem:[%s1633_s5 + $0x8] sm:$0xff] }
  0x34   : > { %1168 = vmatpush3.msra.mxu0 %v709_v39 }
  0x35   : > { %1099 = vmatmul.mubr.msk.f32.gmra.mxu0 %vm305_vm0, %v295_v29  ;;  %1169 = vmatprep.subr.mxu0 %v708_v40 }
  0x36   : > { %1170 = vmatpush3.msra.mxu0 %v708_v40 }
  0x37   : > { %1171 = vmatprep.subr.mxu0 %v707_v41 }
  0x38   : > { %1172 = vmatpush3.msra.mxu0 %v707_v41 }
  0x39   : > { %1173 = vmatprep.subr.mxu0 %v706_v42 }
  0x3a   : > { %1174 = vmatpush3.msra.mxu0 %v706_v42 }
  0x3b   : > { %1175 = vmatprep.subr.mxu0 %v705_v43 }
  0x3c   : > { %1176 = vmatpush3.msra.mxu0 %v705_v43 }
  0x3d   : > { %1177 = vmatprep.subr.mxu0 %v704_v44 }
  0x3e   : > { %1178 = vmatpush3.msra.mxu0 %v704_v44 }
  0x3f   : > { %1179 = vmatprep.subr.mxu0 %v703_v45 }
  0x40   : > { %1180 = vmatpush3.msra.mxu0 %v703_v45 }
  0x41   : > { %1181 = vmatprep.subr.mxu0 %v702_v46 }
  0x42   : > { %1182 = vmatpush3.msra.mxu0 %v702_v46 }
  0x43   : > { %1183 = vmatprep.subr.mxu0 %v701_v32 }
  0x44   : > { %1184 = vmatpush3.msra.mxu0 %v701_v32 }
  0x45   : > { %1185 = vmatprep.subr.mxu0 %v700_v33 }
  0x46   : > { %1186 = vmatpush3.msra.mxu0 %v700_v33 }
  0x47   : > { %1187 = vmatprep.subr.mxu0 %v699_v34 }
  0x48   : > { %1188 = vmatpush3.msra.mxu0 %v699_v34 }
  0xd9   : > { %v1079_v48 = vpop.f32.mrf.mxu0 }
  0xda   : > { %v426_v49 = vadd.f32 %v1079_v48, %v966_v47 }
  0xdb   : > { %v420_v50 = vpop.f32.mrf.mxu0 }
  0xdc   : > { %v421_v51 = vadd.f32 %v966_v47, %v420_v50  ;;  %v500_v54 = vmax.f32 %v426_v49, 0.0 }
  0xdd   : > { %v1082_v52 = vpop.f32.mrf.mxu0 }
  0xde   : > { %v499_v53 = vmax.f32 %v421_v51, 0.0  ;;  %v436_v55 = vadd.f32 %v1082_v52, %v966_v47 }
  0xdf   : > { %v430_v56 = vpop.f32.mrf.mxu0 }
  0xe0   : > { %v431_v57 = vadd.f32 %v966_v47, %v430_v56  ;;  %1133 = vmatprep.mubr.f32.mxu1 %v499_v53  ;;  %v502_v60 = vmax.f32 %v436_v55, 0.0 }
  0xe1   : > { %v1085_v58 = vpop.f32.mrf.mxu0  ;;  %1134 = vmatmul.mubr.f32.vlgmr.msra.gmra.mxu1 %v500_v54 }
  0xe2   : > { %v501_v59 = vmax.f32 %v431_v57, 0.0  ;;  %v446_v61 = vadd.f32 %v1085_v58, %v966_v47 }
  0xe3   : > { %v440_v62 = vpop.f32.mrf.mxu0 }
  0xe4   : > { %v441_v63 = vadd.f32 %v966_v47, %v440_v62  ;;  %1136 = vmatprep.mubr.f32.mxu1 %v501_v59  ;;  %v504_v2 = vmax.f32 %v446_v61, 0.0 }
  0xe5   : > { %v1088_v0 = vpop.f32.mrf.mxu0  ;;  %1137 = vmatmul.mubr.f32.gmra.mxu1 %v502_v60 }
  0xe6   : > { %v503_v1 = vmax.f32 %v441_v63, 0.0  ;;  %v456_v3 = vadd.f32 %v1088_v0, %v966_v47 }
  0xe7   : > { %v450_v4 = vpop.f32.mrf.mxu0 }
  0xe8   : > { %v451_v5 = vadd.f32 %v966_v47, %v450_v4  ;;  %1139 = vmatprep.mubr.f32.mxu1 %v503_v1  ;;  %v506_v8 = vmax.f32 %v456_v3, 0.0 }
  0xe9   : > { %v1091_v6 = vpop.f32.mrf.mxu0  ;;  %1140 = vmatmul.mubr.f32.gmra.mxu1 %v504_v2 }
  0xea   : > { %v505_v7 = vmax.f32 %v451_v5, 0.0  ;;  %v466_v9 = vadd.f32 %v1091_v6, %v966_v47 }
  0xeb   : > { %v460_v10 = vpop.f32.mrf.mxu0 }
  0xec   : > { %v461_v11 = vadd.f32 %v966_v47, %v460_v10  ;;  %1142 = vmatprep.mubr.f32.mxu1 %v505_v7  ;;  %v508_v14 = vmax.f32 %v466_v9, 0.0 }
  0xed   : > { %v1094_v12 = vpop.f32.mrf.mxu0  ;;  %1143 = vmatmul.mubr.f32.gmra.mxu1 %v506_v8 }
  0xee   : > { %v507_v13 = vmax.f32 %v461_v11, 0.0  ;;  %v476_v15 = vadd.f32 %v1094_v12, %v966_v47 }
  0xef   : > { %v470_v16 = vpop.f32.mrf.mxu0 }
  0xf0   : > { %v471_v17 = vadd.f32 %v966_v47, %v470_v16  ;;  %1145 = vmatprep.mubr.f32.mxu1 %v507_v13  ;;  %v510_v20 = vmax.f32 %v476_v15, 0.0 }
  0xf1   : > { %v1097_v18 = vpop.f32.mrf.mxu0  ;;  %1146 = vmatmul.mubr.f32.gmra.mxu1 %v508_v14 }
  0xf2   : > { %v509_v19 = vmax.f32 %v471_v17, 0.0  ;;  %v486_v21 = vadd.f32 %v1097_v18, %v966_v47 }
  0xf3   : > { %v480_v22 = vpop.f32.mrf.mxu0 }
  0xf4   : > { %v481_v23 = vadd.f32 %v966_v47, %v480_v22  ;;  %1148 = vmatprep.mubr.f32.mxu1 %v509_v19  ;;  %v512_v26 = vmax.f32 %v486_v21, 0.0 }
  0xf5   : > { %v1100_v24 = vpop.f32.mrf.mxu0  ;;  %1149 = vmatmul.mubr.f32.gmra.mxu1 %v510_v20  ;;  %v984_v20 = vld [vmem:[%s1634_s6] ss:$0 sm:$0xff] }
  0xf6   : > { %v511_v25 = vmax.f32 %v481_v23, 0.0  ;;  %v496_v27 = vadd.f32 %v1100_v24, %v966_v47 }
  0xf7   : > { %v490_v28 = vpop.f32.mrf.mxu0 }
  0xf8   : > { %v491_v29 = vadd.f32 %v966_v47, %v490_v28  ;;  %1151 = vmatprep.mubr.f32.mxu1 %v511_v25  ;;  %v514_v31 = vmax.f32 %v496_v27, 0.0 }
  0xf9   : > { %1152 = vmatmul.mubr.f32.gmra.mxu1 %v512_v26 }
  0xfa   : > { %v513_v30 = vmax.f32 %v491_v29, 0.0 }
  0xfc   : > { %1154 = vmatprep.mubr.f32.mxu1 %v513_v30 }
  0xfd   : > { %1155 = vmatmul.mubr.f32.gmra.mxu1 %v514_v31 }
 0x1a1   : > { %v1135_v36 = vpop.f32.mrf.mxu1 }
 0x1a2   : > { %v610_v37 = vadd.f32 %v1135_v36, %v983_v35 }
 0x1a3   : > { %v604_v38 = vpop.f32.mrf.mxu1 }
 0x1a4   : > { %v605_v39 = vadd.f32 %v983_v35, %v604_v38  ;;  %v684_v42 = vmax.f32 %v610_v37, 0.0 }
 0x1a5   : > { %v1138_v40 = vpop.f32.mrf.mxu1 }
 0x1a6   : > { %v683_v41 = vmax.f32 %v605_v39, 0.0  ;;  %v620_v43 = vadd.f32 %v1138_v40, %v983_v35 }
 0x1a7   : > { %v614_v44 = vpop.f32.mrf.mxu1 }
 0x1a8   : > { %v615_v45 = vadd.f32 %v983_v35, %v614_v44  ;;  %1189 = vmatprep.mubr.f32.mxu0 %v683_v41  ;;  %v686_v48 = vmax.f32 %v620_v43, 0.0 }
 0x1a9   : > { %v1141_v46 = vpop.f32.mrf.mxu1  ;;  %1190 = vmatmul.mubr.f32.vlgmr.msra.gmra.mxu0 %v684_v42 }
 0x1aa   : > { %v685_v47 = vmax.f32 %v615_v45, 0.0  ;;  %v630_v49 = vadd.f32 %v1141_v46, %v983_v35 }
 0x1ab   : > { %v624_v50 = vpop.f32.mrf.mxu1 }
 0x1ac   : > { %v625_v51 = vadd.f32 %v983_v35, %v624_v50  ;;  %1192 = vmatprep.mubr.f32.mxu0 %v685_v47  ;;  %v688_v54 = vmax.f32 %v630_v49, 0.0 }
 0x1ad   : > { %v1144_v52 = vpop.f32.mrf.mxu1  ;;  %1193 = vmatmul.mubr.f32.gmra.mxu0 %v686_v48 }
 0x1ae   : > { %v687_v53 = vmax.f32 %v625_v51, 0.0  ;;  %v640_v55 = vadd.f32 %v1144_v52, %v983_v35 }
 0x1af   : > { %v634_v56 = vpop.f32.mrf.mxu1 }
 0x1b0   : > { %v635_v57 = vadd.f32 %v983_v35, %v634_v56  ;;  %1195 = vmatprep.mubr.f32.mxu0 %v687_v53  ;;  %v690_v60 = vmax.f32 %v640_v55, 0.0 }
 0x1b1   : > { %v1147_v58 = vpop.f32.mrf.mxu1  ;;  %1196 = vmatmul.mubr.f32.gmra.mxu0 %v688_v54 }
 0x1b2   : > { %v689_v59 = vmax.f32 %v635_v57, 0.0  ;;  %v650_v61 = vadd.f32 %v1147_v58, %v983_v35 }
 0x1b3   : > { %v644_v62 = vpop.f32.mrf.mxu1 }
 0x1b4   : > { %v645_v63 = vadd.f32 %v983_v35, %v644_v62  ;;  %1198 = vmatprep.mubr.f32.mxu0 %v689_v59  ;;  %v692_v2 = vmax.f32 %v650_v61, 0.0 }
 0x1b5   : > { %v1150_v0 = vpop.f32.mrf.mxu1  ;;  %1199 = vmatmul.mubr.f32.gmra.mxu0 %v690_v60 }
 0x1b6   : > { %v691_v1 = vmax.f32 %v645_v63, 0.0  ;;  %v660_v3 = vadd.f32 %v1150_v0, %v983_v35 }
 0x1b7   : > { %v654_v4 = vpop.f32.mrf.mxu1 }
 0x1b8   : > { %v655_v5 = vadd.f32 %v983_v35, %v654_v4  ;;  %1201 = vmatprep.mubr.f32.mxu0 %v691_v1  ;;  %v694_v8 = vmax.f32 %v660_v3, 0.0 }
 0x1b9   : > { %v1153_v6 = vpop.f32.mrf.mxu1  ;;  %1202 = vmatmul.mubr.f32.gmra.mxu0 %v692_v2 }
 0x1ba   : > { %v693_v7 = vmax.f32 %v655_v5, 0.0  ;;  %v670_v9 = vadd.f32 %v1153_v6, %v983_v35 }
 0x1bb   : > { %v664_v10 = vpop.f32.mrf.mxu1 }
 0x1bc   : > { %v665_v11 = vadd.f32 %v983_v35, %v664_v10  ;;  %1204 = vmatprep.mubr.f32.mxu0 %v693_v7  ;;  %v696_v14 = vmax.f32 %v670_v9, 0.0 }
 0x1bd   : > { %v1156_v12 = vpop.f32.mrf.mxu1  ;;  %1205 = vmatmul.mubr.f32.gmra.mxu0 %v694_v8 }
 0x1be   : > { %v695_v13 = vmax.f32 %v665_v11, 0.0  ;;  %v680_v15 = vadd.f32 %v1156_v12, %v983_v35 }
 0x1bf   : > { %v674_v16 = vpop.f32.mrf.mxu1 }
 0x1c0   : > { %v675_v17 = vadd.f32 %v983_v35, %v674_v16  ;;  %1207 = vmatprep.mubr.f32.mxu0 %v695_v13  ;;  %v698_v19 = vmax.f32 %v680_v15, 0.0 }
 0x1c1   : > { %1208 = vmatmul.mubr.f32.gmra.mxu0 %v696_v14 }
 0x1c2   : > { %v697_v18 = vmax.f32 %v675_v17, 0.0 }
 0x1c4   : > { %1210 = vmatprep.mubr.f32.mxu0 %v697_v18 }
 0x1c5   : > { %1211 = vmatmul.mubr.f32.gmra.mxu0 %v698_v19 }
 0x269   : > { %v1191_v21 = vpop.f32.mrf.mxu0 }
 0x26a   : > { %v794_v22 = vadd.f32 %v1191_v21, %v984_v20 }
 0x26b   : > { %v788_v23 = vpop.f32.mrf.mxu0 }
 0x26c   : > { %868 = vst [vmem:[%s1559_s15 + $0x8] sm:$0xff] %v794_v22  ;;  %v789_v24 = vadd.f32 %v984_v20, %v788_v23 }
 0x26d   : > { %v1194_v25 = vpop.f32.mrf.mxu0 }
 0x26e   : > { %867 = vst [vmem:[%s1559_s15] sm:$0xff] %v789_v24  ;;  %v804_v26 = vadd.f32 %v1194_v25, %v984_v20 }
 0x26f   : > { %v798_v27 = vpop.f32.mrf.mxu0 }
 0x270   : > { %870 = vst [vmem:[%s1559_s15 + $0x18] sm:$0xff] %v804_v26  ;;  %v799_v28 = vadd.f32 %v984_v20, %v798_v27 }
 0x271   : > { %v1197_v29 = vpop.f32.mrf.mxu0 }
 0x272   : > { %869 = vst [vmem:[%s1559_s15 + $0x10] sm:$0xff] %v799_v28  ;;  %v814_v30 = vadd.f32 %v1197_v29, %v984_v20 }
 0x273   : > { %v808_v31 = vpop.f32.mrf.mxu0 }
 0x274   : > { %872 = vst [vmem:[%s1559_s15 + $0x28] sm:$0xff] %v814_v30  ;;  %v809_v32 = vadd.f32 %v984_v20, %v808_v31 }
 0x275   : > { %v1200_v33 = vpop.f32.mrf.mxu0 }
 0x276   : > { %871 = vst [vmem:[%s1559_s15 + $0x20] sm:$0xff] %v809_v32  ;;  %v824_v34 = vadd.f32 %v1200_v33, %v984_v20 }
 0x277   : > { %v818_v35 = vpop.f32.mrf.mxu0 }
 0x278   : > { %874 = vst [vmem:[%s1559_s15 + $0x38] sm:$0xff] %v824_v34  ;;  %v819_v36 = vadd.f32 %v984_v20, %v818_v35 }
 0x279   : > { %v1203_v37 = vpop.f32.mrf.mxu0 }
 0x27a   : > { %873 = vst [vmem:[%s1559_s15 + $0x30] sm:$0xff] %v819_v36  ;;  %v834_v38 = vadd.f32 %v1203_v37, %v984_v20 }
 0x27b   : > { %v828_v39 = vpop.f32.mrf.mxu0 }
 0x27c   : > { %876 = vst [vmem:[%s1559_s15 + $0x48] sm:$0xff] %v834_v38  ;;  %v829_v40 = vadd.f32 %v984_v20, %v828_v39 }
 0x27d   : > { %v1206_v41 = vpop.f32.mrf.mxu0 }
 0x27e   : > { %875 = vst [vmem:[%s1559_s15 + $0x40] sm:$0xff] %v829_v40  ;;  %v844_v42 = vadd.f32 %v1206_v41, %v984_v20 }
 0x27f   : > { %v838_v43 = vpop.f32.mrf.mxu0 }
 0x280   : > { %878 = vst [vmem:[%s1559_s15 + $0x58] sm:$0xff] %v844_v42  ;;  %v839_v44 = vadd.f32 %v984_v20, %v838_v43 }
 0x281   : > { %v1209_v45 = vpop.f32.mrf.mxu0 }
 0x282   : > { %877 = vst [vmem:[%s1559_s15 + $0x50] sm:$0xff] %v839_v44  ;;  %v854_v46 = vadd.f32 %v1209_v45, %v984_v20 }
 0x283   : > { %v848_v47 = vpop.f32.mrf.mxu0 }
 0x284   : > { %880 = vst [vmem:[%s1559_s15 + $0x68] sm:$0xff] %v854_v46  ;;  %v849_v48 = vadd.f32 %v984_v20, %v848_v47 }
 0x285   : > { %v1212_v49 = vpop.f32.mrf.mxu0 }
 0x286   : > { %879 = vst [vmem:[%s1559_s15 + $0x60] sm:$0xff] %v849_v48  ;;  %v864_v50 = vadd.f32 %v1212_v49, %v984_v20 }
 0x287   : > { %v858_v51 = vpop.f32.mrf.mxu0 }
 0x288   : > { %882 = vst [vmem:[%s1559_s15 + $0x78] sm:$0xff] %v864_v50  ;;  %v859_v52 = vadd.f32 %v984_v20, %v858_v51 }
 0x28a   : > { %881 = vst [vmem:[%s1559_s15 + $0x70] sm:$0xff] %v859_v52 }
 0x28b   : > { %1267 = shalt.err (!%p1264_p3)
}
 0x28c   : > { %s1268_s21 = scalar_lea.hbm %s1580_s16, 2048  ;;  %s1272_s29 = scalar_lea.hbm %s1635_s7, 4096 }
 0x28d   : > { %p1269_p4 = scmp.ne.s32.totalorder %s1580_s16, %s1268_s21  ;;  %p1273_p9 = scmp.lt.s32.totalorder %s1580_s16, %s1635_s7 }
 0x28e   : > { %p1274_p10 = scmp.lt.s32.totalorder %s1272_s29, %s1268_s21 }
 0x28f   : > { %p1270_p7 = pnand %p1269_p4, %p1397_p5 }
 0x290   : > { %p1275_p11 = por %p1274_p10, %p1273_p9 }
 0x291   : > { %p1271_p8 = pneg %p1270_p7 }
 0x293   : > { %p1276_p12 = pnand %p1275_p11, %p1271_p8 }
 0x295   : > { %1279 = shalt.err (!%p1276_p12)
}
 0x296   : > { %s1317_s13 = smov 128   ;;  %s1318_s14 = smov 8  }
 0x297   : > { %1213 = dma.vmem_to_hbm [thread:$0]  (%p1397_p5), %s1582_s9, 2048, %s1580_s16, %s1588_s28, %s1317_s13, %s1317_s13, %s1318_s14  }
 0x298 PF: > { %p1219_p13 = scmp.ge.s32.totalorder %s1314_s27, 2  ;;  %s912_s18 = sand.u32 1, %s1302_s24  }
 0x299   : > { %s913_s17 = scalar_lea.sflag [#allocation3], %s912_s18 }
 0x29a   : > { %p1216_p0 = pnand %p1219_p13, %p1401_p6 }
 0x29c   : > { %p1217_p1 = pneg %p1216_p0 }
 0x29e   : > { %1297 = dma.done.wait (%p1217_p1), %s913_s17, 2048  }
 0x29f   : > { %1299 = vsyncadd (%p1217_p1), %s913_s17, 4294965248  ;;  %p17_p2 = scmp.ge.s32.totalorder %s1384_s30, 4   ;;  %s1638_s24 = smov %s1306_s25 }
 0x2a0   : > { %s1639_s25 = smov %s1310_s26  ;;  %s1640_s26 = smov %s1395_s10 }
 0x2a1   : > { %s1641_s27 = smov %s1384_s30  ;;  %19 = sbr.rel (!%p17_p2) target bundleno = 3 (0x3), region = 83 }
 0x2a6   :  { %918 = vsyncpa [#allocation3], 1 }
 0x2a7   :  { %920 = vsyncpa [#allocation3 + $0x1], 1 }

// kernel: tpu_custom_call.1
= control target key start
LH: loop header
LB: loop body
LE: loop exit
PB: predicated region body
PF: predicated region fallthrough
CT: control target
= control target key end

     0   :  { %12 = vsyncpa [#allocation3], 0  ;;  %s1628_s0 = inlined_call_operand.vmem [shape: f32[256,16], index: 0, kind: input, shape index: {}]   ;;  %s1629_s1 = inlined_call_operand.vmem [shape: f32[16,128], index: 1, kind: input, shape index: {}]   ;;  %s1630_s2 = inlined_call_operand.vmem [shape: f32[1,128], index: 2, kind: input, shape index: {}]   ;;  %s1631_s3 = inlined_call_operand.vmem [shape: f32[128,128], index: 3, kind: input, shape index: {}]   ;;  %s1632_s4 = inlined_call_operand.vmem [shape: f32[1,128], index: 4, kind: input, shape index: {}]   ;;  %s1633_s5 = inlined_call_operand.vmem [shape: f32[128,128], index: 5, kind: input, shape index: {}]   ;;  %s1634_s6 = inlined_call_operand.vmem [shape: f32[1,128], index: 6, kind: input, shape index: {}]   ;;  %s1635_s7 = inlined_call_operand.hbm [shape: f32[256,128], index: 7, kind: output, shape index: {}]  }
   0x1   :  { %14 = vsyncpa [#allocation3 + $0x1], 0  ;;  %s1359_s24 = smov 0   ;;  %s1361_s25 = smov 0  }
   0x2   :  { %s1363_s26 = smov 0   ;;  %s1365_s27 = smov 0  }
   0x3 LB: > { %s1380_s28 = sadd.s32 4294967295, %s1314_s27   ;;  %s959_s29 = sadd.s32 4294967294, %s1314_s27   ;;  %s1314_s27 = sphi %s1365_s27, %s1641_s27   ;;  %s1310_s26 = sphi %s1363_s26, %s1640_s26   ;;  %s1306_s25 = sphi %s1361_s25, %s1639_s25   ;;  %s1302_s24 = sphi %s1359_s24, %s1638_s24  }
   0x4   : > { %s1384_s30 = sadd.s32 1, %s1314_s27   ;;  %s179_s8 = sadd.s32 1, %s1310_s26 }
   0x5   : > { %s176_s9 = ssub.s32 %s1314_s27, %s1384_s30  ;;  %p189_p0 = scmp.ne.s32.totalorder %s1310_s26, %s1306_s25 }
   0x6   : > { %p177_p1 = scmp.eq.s32.totalorder %s176_s9, 0  ;;  %p190_p2 = scmp.eq.s32.totalorder %s1380_s28, 1 }
   0x7   : > { %p195_p3 = scmp.ne.s32.totalorder %s1306_s25, %s1302_s24  ;;  %p196_p4 = scmp.eq.s32.totalorder %s959_s29, 1 }
   0x8   : > { %s1395_s10 = scalar_select %p177_p1, %s1310_s26, %s179_s8  }
   0x9   : > { %p1397_p5 = por %p190_p2, %p189_p0  ;;  %p1401_p6 = por %p196_p4, %p195_p3 }
   0xa   : > { %p962_p7 = scmp.ge.s32.totalorder %s1314_s27, 1  ;;  %p241_p8 = scmp.lt.s32.totalorder %s1314_s27, 3 }
   0xc   : > { %p242_p9 = pnand %p962_p7, %p241_p8 }
   0xd   : > { %s964_s17 = sshll.u32 (!%p242_p9), %s1380_s28, 4  ;;  %s270_s21 = sand.u32 (!%p242_p9), 1, %s1306_s25  }
   0xe   : > { %245 = sbr.rel (%p242_p9) target bundleno = 664 (0x298), region = 48  ;;  %p274_p10 = scmp.lt.s32.totalorder (!%p242_p9), %s964_s17, 31 }
   0xf   : > { %s963_s22 = sshll.u32 (!%p242_p9), %s270_s21, 7  ;;  %s990_s8 = sshll.u32 (!%p242_p9), %s1380_s28, 11 }
  0x10   : > { %s1580_s16 = scalar_lea.hbm (!%p242_p9), %s1635_s7, %s990_s8  ;;  %s1588_s28 = scalar_lea.sflag (!%p242_p9), [#allocation3], %s270_s21 }
  0x13   : > { %v297_v0 = vld [vmem:[%s1629_s1 + $0x8] sm:$0xff]  ;;  %v296_v1 = vld [vmem:[%s1629_s1] sm:$0xff]  ;;  %v530_v2 = vld [vmem:[%s1631_s3 + $0x78] sm:$0xff]  ;;  %s1643_s17 = smov (!%p274_p10, %s964_s17), 31  ;;  %vm305_vm0 = vcmask 130048  }
  0x14   : > { %1073 = vmatprep.subr.mxu0 %v297_v0  ;;  %1101 = vmatprep.subr.mxu1 %v530_v2  ;;  %v529_v3 = vld [vmem:[%s1631_s3 + $0x70] sm:$0xff]  ;;  %v528_v4 = vld [vmem:[%s1631_s3 + $0x68] sm:$0xff]  ;;  %v527_v5 = vld [vmem:[%s1631_s3 + $0x60] sm:$0xff]  ;;  %s965_s9 = sshll.u32 %s1643_s17, 3  ;;  %s1316_s17 = smov [#allocation2]  }
  0x15   : > { %1074 = vmatpush3.msra.mxu0 %v297_v0  ;;  %1102 = vmatpush3.msra.mxu1 %v530_v2  ;;  %s1429_s15 = scalar_lea.vmem %s1628_s0, %s965_s9  ;;  %v526_v6 = vld [vmem:[%s1631_s3 + $0x58] sm:$0xff]  ;;  %v525_v10 = vld [vmem:[%s1631_s3 + $0x50] sm:$0xff]  ;;  %v524_v12 = vld [vmem:[%s1631_s3 + $0x48] sm:$0xff]  ;;  %s1258_s19 = sshll.u32 %s1316_s17, 4  ;;  %s1259_s19 = int_to_ptr.vmem [resolvable:$false] %s1258_s19 }
  0x16   : > { %1075 = vmatprep.subr.mxu0 %v296_v1  ;;  %1103 = vmatprep.subr.mxu1 %v529_v3  ;;  %v280_v7 = vld [vmem:[%s1429_s15] sm:$0xff]  ;;  %v281_v8 = vld [vmem:[%s1429_s15 + $0x8] sm:$0xff]  ;;  %v282_v9 = vld [vmem:[%s1429_s15 + $0x10] sm:$0xff]  ;;  %s1260_s20 = scalar_lea.vmem %s1259_s19, 4096 }
  0x17   : > { %1076 = vmatpush3.msra.mxu0 %v296_v1  ;;  %1104 = vmatpush3.msra.mxu1 %v529_v3  ;;  %v283_v11 = vld [vmem:[%s1429_s15 + $0x18] sm:$0xff]  ;;  %v284_v13 = vld [vmem:[%s1429_s15 + $0x20] sm:$0xff]  ;;  %v285_v15 = vld [vmem:[%s1429_s15 + $0x28] sm:$0xff] }
  0x18   : > { %1105 = vmatprep.subr.mxu1 %v528_v4  ;;  %1077 = vmatprep.mubr.msk.f32.mxu0 %vm305_vm0, %v280_v7  ;;  %v523_v14 = vld [vmem:[%s1631_s3 + $0x40] sm:$0xff]  ;;  %v522_v16 = vld [vmem:[%s1631_s3 + $0x38] sm:$0xff]  ;;  %v286_v17 = vld [vmem:[%s1429_s15 + $0x30] sm:$0xff] }
  0x19   : > { %1106 = vmatpush3.msra.mxu1 %v528_v4  ;;  %1078 = vmatmul.mubr.msk.f32.vlgmr.msra.gmra.mxu0 %vm305_vm0, %v281_v8  ;;  %v521_v18 = vld [vmem:[%s1631_s3 + $0x30] sm:$0xff]  ;;  %v287_v19 = vld [vmem:[%s1429_s15 + $0x38] sm:$0xff]  ;;  %v520_v20 = vld [vmem:[%s1631_s3 + $0x28] sm:$0xff] }
  0x1a   : > { %1107 = vmatprep.subr.mxu1 %v527_v5  ;;  %1080 = vmatprep.mubr.msk.f32.mxu0 %vm305_vm0, %v282_v9  ;;  %v288_v21 = vld [vmem:[%s1429_s15 + $0x40] sm:$0xff]  ;;  %v289_v23 = vld [vmem:[%s1429_s15 + $0x48] sm:$0xff]  ;;  %v290_v24 = vld [vmem:[%s1429_s15 + $0x50] sm:$0xff] }
  0x1b   : > { %1108 = vmatpush3.msra.mxu1 %v527_v5  ;;  %v519_v22 = vld [vmem:[%s1631_s3 + $0x20] sm:$0xff]  ;;  %v291_v25 = vld [vmem:[%s1429_s15 + $0x58] sm:$0xff]  ;;  %v293_v27 = vld [vmem:[%s1429_s15 + $0x68] sm:$0xff] }
  0x1c   : > { %1109 = vmatprep.subr.mxu1 %v526_v6  ;;  %v292_v26 = vld [vmem:[%s1429_s15 + $0x60] sm:$0xff]  ;;  %v294_v28 = vld [vmem:[%s1429_s15 + $0x70] sm:$0xff]  ;;  %v295_v29 = vld [vmem:[%s1429_s15 + $0x78] sm:$0xff]  ;;  %s1559_s15 = scalar_lea.vmem [#allocation2], %s963_s22 }
  0x1d   : > { %1110 = vmatpush3.msra.mxu1 %v526_v6  ;;  %1081 = vmatmul.mubr.msk.f32.gmra.mxu0 %vm305_vm0, %v283_v11  ;;  %v518_v30 = vld [vmem:[%s1631_s3 + $0x18] sm:$0xff]  ;;  %v517_v31 = vld [vmem:[%s1631_s3 + $0x10] sm:$0xff]  ;;  %v516_v32 = vld [vmem:[%s1631_s3 + $0x8] sm:$0xff]  ;;  %s897_s9 = sshll.u32 %s1559_s15, 4  ;;  %s1582_s9 = int_to_ptr.vmem [resolvable:$true] %s897_s9 }
  0x1e   : > { %1111 = vmatprep.subr.mxu1 %v525_v10  ;;  %1083 = vmatprep.mubr.msk.f32.mxu0 %vm305_vm0, %v284_v13  ;;  %v515_v33 = vld [vmem:[%s1631_s3] sm:$0xff]  ;;  %v714_v34 = vld [vmem:[%s1633_s5 + $0x78] sm:$0xff]  ;;  %v713_v35 = vld [vmem:[%s1633_s5 + $0x70] sm:$0xff]  ;;  %s1254_s18 = scalar_lea.vmem %s1582_s9, 2048  ;;  %p1261_p0 = scmp.lt.s32.totalorder %s1582_s9, %s1259_s19 }
  0x1f   : > { %1112 = vmatpush3.msra.mxu1 %v525_v10  ;;  %1157 = vmatprep.subr.mxu0 %v714_v34  ;;  %v712_v36 = vld [vmem:[%s1633_s5 + $0x68] sm:$0xff]  ;;  %v711_v37 = vld [vmem:[%s1633_s5 + $0x60] sm:$0xff]  ;;  %v710_v38 = vld [vmem:[%s1633_s5 + $0x58] sm:$0xff]  ;;  %p1255_p11 = scmp.ne.s32.totalorder %s1582_s9, %s1254_s18  ;;  %p1262_p1 = scmp.lt.s32.totalorder %s1260_s20, %s1254_s18 }
  0x20   : > { %1113 = vmatprep.subr.mxu1 %v524_v12  ;;  %1158 = vmatpush3.msra.mxu0 %v714_v34  ;;  %v709_v39 = vld [vmem:[%s1633_s5 + $0x50] sm:$0xff]  ;;  %v708_v40 = vld [vmem:[%s1633_s5 + $0x48] sm:$0xff]  ;;  %v707_v41 = vld [vmem:[%s1633_s5 + $0x40] sm:$0xff] }
  0x21   : > { %1114 = vmatpush3.msra.mxu1 %v524_v12  ;;  %1084 = vmatmul.mubr.msk.f32.gmra.mxu0 %vm305_vm0, %v285_v15  ;;  %v706_v42 = vld [vmem:[%s1633_s5 + $0x38] sm:$0xff]  ;;  %v705_v43 = vld [vmem:[%s1633_s5 + $0x30] sm:$0xff]  ;;  %v704_v44 = vld [vmem:[%s1633_s5 + $0x28] sm:$0xff]  ;;  %p1256_p12 = pnand %p1255_p11, %p1397_p5  ;;  %p1263_p2 = por %p1262_p1, %p1261_p0 }
  0x22   : > { %1115 = vmatprep.subr.mxu1 %v523_v14  ;;  %1086 = vmatprep.mubr.msk.f32.mxu0 %vm305_vm0, %v286_v17  ;;  %v703_v45 = vld [vmem:[%s1633_s5 + $0x20] sm:$0xff]  ;;  %v702_v46 = vld [vmem:[%s1633_s5 + $0x18] sm:$0xff] }
  0x23   : > { %1116 = vmatpush3.msra.mxu1 %v523_v14  ;;  %1159 = vmatprep.subr.mxu0 %v713_v35  ;;  %v966_v47 = vld [vmem:[%s1630_s2] ss:$0 sm:$0xff]  ;;  %p1257_p13 = pneg %p1256_p12 }
  0x24   : > { %1117 = vmatprep.subr.mxu1 %v522_v16  ;;  %1160 = vmatpush3.msra.mxu0 %v713_v35  ;;  %v699_v34 = vld [vmem:[%s1633_s5] sm:$0xff] }
  0x25   : > { %1118 = vmatpush3.msra.mxu1 %v522_v16  ;;  %1087 = vmatmul.mubr.msk.f32.gmra.mxu0 %vm305_vm0, %v287_v19  ;;  %v983_v35 = vld [vmem:[%s1632_s4] ss:$0 sm:$0xff]  ;;  %p1264_p3 = pnand %p1263_p2, %p1257_p13 }
  0x26   : > { %1119 = vmatprep.subr.mxu1 %v521_v18  ;;  %1089 = vmatprep.mubr.msk.f32.mxu0 %vm305_vm0, %v288_v21 }
  0x27   : > { %1120 = vmatpush3.msra.mxu1 %v521_v18  ;;  %1161 = vmatprep.subr.mxu0 %v712_v36 }
  0x28   : > { %1121 = vmatprep.subr.mxu1 %v520_v20  ;;  %1162 = vmatpush3.msra.mxu0 %v712_v36 }
  0x29   : > { %1122 = vmatpush3.msra.mxu1 %v520_v20  ;;  %1090 = vmatmul.mubr.msk.f32.gmra.mxu0 %vm305_vm0, %v289_v23 }
  0x2a   : > { %1123 = vmatprep.subr.mxu1 %v519_v22  ;;  %1092 = vmatprep.mubr.msk.f32.mxu0 %vm305_vm0, %v290_v24 }
  0x2b   : > { %1124 = vmatpush3.msra.mxu1 %v519_v22  ;;  %1163 = vmatprep.subr.mxu0 %v711_v37 }
  0x2c   : > { %1125 = vmatprep.subr.mxu1 %v518_v30  ;;  %1164 = vmatpush3.msra.mxu0 %v711_v37 }
  0x2d   : > { %1093 = vmatmul.mubr.msk.f32.gmra.mxu0 %vm305_vm0, %v291_v25  ;;  %1126 = vmatpush3.msra.mxu1 %v518_v30 }
  0x2e   : > { %1095 = vmatprep.mubr.msk.f32.mxu0 %vm305_vm0, %v292_v26  ;;  %1127 = vmatprep.subr.mxu1 %v517_v31 }
  0x2f   : > { %1128 = vmatpush3.msra.mxu1 %v517_v31  ;;  %1165 = vmatprep.subr.mxu0 %v710_v38 }
  0x30   : > { %1129 = vmatprep.subr.mxu1 %v516_v32  ;;  %1166 = vmatpush3.msra.mxu0 %v710_v38 }
  0x31   : > { %1096 = vmatmul.mubr.msk.f32.gmra.mxu0 %vm305_vm0, %v293_v27  ;;  %1130 = vmatpush3.msra.mxu1 %v516_v32  ;;  %v701_v32 = vld [vmem:[%s1633_s5 + $0x10] sm:$0xff] }
  0x32   : > { %1098 = vmatprep.mubr.msk.f32.mxu0 %vm305_vm0, %v294_v28  ;;  %1131 = vmatprep.subr.mxu1 %v515_v33 }
  0x33   : > { %1132 = vmatpush3.msra.mxu1 %v515_v33  ;;  %1167 = vmatprep.subr.mxu0 %v709_v39  ;;  %v700_v33 = vld [vmem:[%s1633_s5 + $0x8] sm:$0xff] }
  0x34   : > { %1168 = vmatpush3.msra.mxu0 %v709_v39 }
  0x35   : > { %1099 = vmatmul.mubr.msk.f32.gmra.mxu0 %vm305_vm0, %v295_v29  ;;  %1169 = vmatprep.subr.mxu0 %v708_v40 }
  0x36   : > { %1170 = vmatpush3.msra.mxu0 %v708_v40 }
  0x37   : > { %1171 = vmatprep.subr.mxu0 %v707_v41 }
  0x38   : > { %1172 = vmatpush3.msra.mxu0 %v707_v41 }
  0x39   : > { %1173 = vmatprep.subr.mxu0 %v706_v42 }
  0x3a   : > { %1174 = vmatpush3.msra.mxu0 %v706_v42 }
  0x3b   : > { %1175 = vmatprep.subr.mxu0 %v705_v43 }
  0x3c   : > { %1176 = vmatpush3.msra.mxu0 %v705_v43 }
  0x3d   : > { %1177 = vmatprep.subr.mxu0 %v704_v44 }
  0x3e   : > { %1178 = vmatpush3.msra.mxu0 %v704_v44 }
  0x3f   : > { %1179 = vmatprep.subr.mxu0 %v703_v45 }
  0x40   : > { %1180 = vmatpush3.msra.mxu0 %v703_v45 }
  0x41   : > { %1181 = vmatprep.subr.mxu0 %v702_v46 }
  0x42   : > { %1182 = vmatpush3.msra.mxu0 %v702_v46 }
  0x43   : > { %1183 = vmatprep.subr.mxu0 %v701_v32 }
  0x44   : > { %1184 = vmatpush3.msra.mxu0 %v701_v32 }
  0x45   : > { %1185 = vmatprep.subr.mxu0 %v700_v33 }
  0x46   : > { %1186 = vmatpush3.msra.mxu0 %v700_v33 }
  0x47   : > { %1187 = vmatprep.subr.mxu0 %v699_v34 }
  0x48   : > { %1188 = vmatpush3.msra.mxu0 %v699_v34 }
  0xd9   : > { %v1079_v48 = vpop.f32.mrf.mxu0 }
  0xda   : > { %v426_v49 = vadd.f32 %v1079_v48, %v966_v47 }
  0xdb   : > { %v420_v50 = vpop.f32.mrf.mxu0 }
  0xdc   : > { %v421_v51 = vadd.f32 %v966_v47, %v420_v50  ;;  %v500_v54 = vmax.f32 %v426_v49, 0.0 }
  0xdd   : > { %v1082_v52 = vpop.f32.mrf.mxu0 }
  0xde   : > { %v499_v53 = vmax.f32 %v421_v51, 0.0  ;;  %v436_v55 = vadd.f32 %v1082_v52, %v966_v47 }
  0xdf   : > { %v430_v56 = vpop.f32.mrf.mxu0 }
  0xe0   : > { %v431_v57 = vadd.f32 %v966_v47, %v430_v56  ;;  %1133 = vmatprep.mubr.f32.mxu1 %v499_v53  ;;  %v502_v60 = vmax.f32 %v436_v55, 0.0 }
  0xe1   : > { %v1085_v58 = vpop.f32.mrf.mxu0  ;;  %1134 = vmatmul.mubr.f32.vlgmr.msra.gmra.mxu1 %v500_v54 }
  0xe2   : > { %v501_v59 = vmax.f32 %v431_v57, 0.0  ;;  %v446_v61 = vadd.f32 %v1085_v58, %v966_v47 }
  0xe3   : > { %v440_v62 = vpop.f32.mrf.mxu0 }
  0xe4   : > { %v441_v63 = vadd.f32 %v966_v47, %v440_v62  ;;  %1136 = vmatprep.mubr.f32.mxu1 %v501_v59  ;;  %v504_v2 = vmax.f32 %v446_v61, 0.0 }
  0xe5   : > { %v1088_v0 = vpop.f32.mrf.mxu0  ;;  %1137 = vmatmul.mubr.f32.gmra.mxu1 %v502_v60 }
  0xe6   : > { %v503_v1 = vmax.f32 %v441_v63, 0.0  ;;  %v456_v3 = vadd.f32 %v1088_v0, %v966_v47 }
  0xe7   : > { %v450_v4 = vpop.f32.mrf.mxu0 }
  0xe8   : > { %v451_v5 = vadd.f32 %v966_v47, %v450_v4  ;;  %1139 = vmatprep.mubr.f32.mxu1 %v503_v1  ;;  %v506_v8 = vmax.f32 %v456_v3, 0.0 }
  0xe9   : > { %v1091_v6 = vpop.f32.mrf.mxu0  ;;  %1140 = vmatmul.mubr.f32.gmra.mxu1 %v504_v2 }
  0xea   : > { %v505_v7 = vmax.f32 %v451_v5, 0.0  ;;  %v466_v9 = vadd.f32 %v1091_v6, %v966_v47 }
  0xeb   : > { %v460_v10 = vpop.f32.mrf.mxu0 }
  0xec   : > { %v461_v11 = vadd.f32 %v966_v47, %v460_v10  ;;  %1142 = vmatprep.mubr.f32.mxu1 %v505_v7  ;;  %v508_v14 = vmax.f32 %v466_v9, 0.0 }
  0xed   : > { %v1094_v12 = vpop.f32.mrf.mxu0  ;;  %1143 = vmatmul.mubr.f32.gmra.mxu1 %v506_v8 }
  0xee   : > { %v507_v13 = vmax.f32 %v461_v11, 0.0  ;;  %v476_v15 = vadd.f32 %v1094_v12, %v966_v47 }
  0xef   : > { %v470_v16 = vpop.f32.mrf.mxu0 }
  0xf0   : > { %v471_v17 = vadd.f32 %v966_v47, %v470_v16  ;;  %1145 = vmatprep.mubr.f32.mxu1 %v507_v13  ;;  %v510_v20 = vmax.f32 %v476_v15, 0.0 }
  0xf1   : > { %v1097_v18 = vpop.f32.mrf.mxu0  ;;  %1146 = vmatmul.mubr.f32.gmra.mxu1 %v508_v14 }
  0xf2   : > { %v509_v19 = vmax.f32 %v471_v17, 0.0  ;;  %v486_v21 = vadd.f32 %v1097_v18, %v966_v47 }
  0xf3   : > { %v480_v22 = vpop.f32.mrf.mxu0 }
  0xf4   : > { %v481_v23 = vadd.f32 %v966_v47, %v480_v22  ;;  %1148 = vmatprep.mubr.f32.mxu1 %v509_v19  ;;  %v512_v26 = vmax.f32 %v486_v21, 0.0 }
  0xf5   : > { %v1100_v24 = vpop.f32.mrf.mxu0  ;;  %1149 = vmatmul.mubr.f32.gmra.mxu1 %v510_v20  ;;  %v984_v20 = vld [vmem:[%s1634_s6] ss:$0 sm:$0xff] }
  0xf6   : > { %v511_v25 = vmax.f32 %v481_v23, 0.0  ;;  %v496_v27 = vadd.f32 %v1100_v24, %v966_v47 }
  0xf7   : > { %v490_v28 = vpop.f32.mrf.mxu0 }
  0xf8   : > { %v491_v29 = vadd.f32 %v966_v47, %v490_v28  ;;  %1151 = vmatprep.mubr.f32.mxu1 %v511_v25  ;;  %v514_v31 = vmax.f32 %v496_v27, 0.0 }
  0xf9   : > { %1152 = vmatmul.mubr.f32.gmra.mxu1 %v512_v26 }
  0xfa   : > { %v513_v30 = vmax.f32 %v491_v29, 0.0 }
  0xfc   : > { %1154 = vmatprep.mubr.f32.mxu1 %v513_v30 }
  0xfd   : > { %1155 = vmatmul.mubr.f32.gmra.mxu1 %v514_v31 }
 0x1a1   : > { %v1135_v36 = vpop.f32.mrf.mxu1 }
 0x1a2   : > { %v610_v37 = vadd.f32 %v1135_v36, %v983_v35 }
 0x1a3   : > { %v604_v38 = vpop.f32.mrf.mxu1 }
 0x1a4   : > { %v605_v39 = vadd.f32 %v983_v35, %v604_v38  ;;  %v684_v42 = vmax.f32 %v610_v37, 0.0 }
 0x1a5   : > { %v1138_v40 = vpop.f32.mrf.mxu1 }
 0x1a6   : > { %v683_v41 = vmax.f32 %v605_v39, 0.0  ;;  %v620_v43 = vadd.f32 %v1138_v40, %v983_v35 }
 0x1a7   : > { %v614_v44 = vpop.f32.mrf.mxu1 }
 0x1a8   : > { %v615_v45 = vadd.f32 %v983_v35, %v614_v44  ;;  %1189 = vmatprep.mubr.f32.mxu0 %v683_v41  ;;  %v686_v48 = vmax.f32 %v620_v43, 0.0 }
 0x1a9   : > { %v1141_v46 = vpop.f32.mrf.mxu1  ;;  %1190 = vmatmul.mubr.f32.vlgmr.msra.gmra.mxu0 %v684_v42 }
 0x1aa   : > { %v685_v47 = vmax.f32 %v615_v45, 0.0  ;;  %v630_v49 = vadd.f32 %v1141_v46, %v983_v35 }
 0x1ab   : > { %v624_v50 = vpop.f32.mrf.mxu1 }
 0x1ac   : > { %v625_v51 = vadd.f32 %v983_v35, %v624_v50  ;;  %1192 = vmatprep.mubr.f32.mxu0 %v685_v47  ;;  %v688_v54 = vmax.f32 %v630_v49, 0.0 }
 0x1ad   : > { %v1144_v52 = vpop.f32.mrf.mxu1  ;;  %1193 = vmatmul.mubr.f32.gmra.mxu0 %v686_v48 }
 0x1ae   : > { %v687_v53 = vmax.f32 %v625_v51, 0.0  ;;  %v640_v55 = vadd.f32 %v1144_v52, %v983_v35 }
 0x1af   : > { %v634_v56 = vpop.f32.mrf.mxu1 }
 0x1b0   : > { %v635_v57 = vadd.f32 %v983_v35, %v634_v56  ;;  %1195 = vmatprep.mubr.f32.mxu0 %v687_v53  ;;  %v690_v60 = vmax.f32 %v640_v55, 0.0 }
 0x1b1   : > { %v1147_v58 = vpop.f32.mrf.mxu1  ;;  %1196 = vmatmul.mubr.f32.gmra.mxu0 %v688_v54 }
 0x1b2   : > { %v689_v59 = vmax.f32 %v635_v57, 0.0  ;;  %v650_v61 = vadd.f32 %v1147_v58, %v983_v35 }
 0x1b3   : > { %v644_v62 = vpop.f32.mrf.mxu1 }
 0x1b4   : > { %v645_v63 = vadd.f32 %v983_v35, %v644_v62  ;;  %1198 = vmatprep.mubr.f32.mxu0 %v689_v59  ;;  %v692_v2 = vmax.f32 %v650_v61, 0.0 }
 0x1b5   : > { %v1150_v0 = vpop.f32.mrf.mxu1  ;;  %1199 = vmatmul.mubr.f32.gmra.mxu0 %v690_v60 }
 0x1b6   : > { %v691_v1 = vmax.f32 %v645_v63, 0.0  ;;  %v660_v3 = vadd.f32 %v1150_v0, %v983_v35 }
 0x1b7   : > { %v654_v4 = vpop.f32.mrf.mxu1 }
 0x1b8   : > { %v655_v5 = vadd.f32 %v983_v35, %v654_v4  ;;  %1201 = vmatprep.mubr.f32.mxu0 %v691_v1  ;;  %v694_v8 = vmax.f32 %v660_v3, 0.0 }
 0x1b9   : > { %v1153_v6 = vpop.f32.mrf.mxu1  ;;  %1202 = vmatmul.mubr.f32.gmra.mxu0 %v692_v2 }
 0x1ba   : > { %v693_v7 = vmax.f32 %v655_v5, 0.0  ;;  %v670_v9 = vadd.f32 %v1153_v6, %v983_v35 }
 0x1bb   : > { %v664_v10 = vpop.f32.mrf.mxu1 }
 0x1bc   : > { %v665_v11 = vadd.f32 %v983_v35, %v664_v10  ;;  %1204 = vmatprep.mubr.f32.mxu0 %v693_v7  ;;  %v696_v14 = vmax.f32 %v670_v9, 0.0 }
 0x1bd   : > { %v1156_v12 = vpop.f32.mrf.mxu1  ;;  %1205 = vmatmul.mubr.f32.gmra.mxu0 %v694_v8 }
 0x1be   : > { %v695_v13 = vmax.f32 %v665_v11, 0.0  ;;  %v680_v15 = vadd.f32 %v1156_v12, %v983_v35 }
 0x1bf   : > { %v674_v16 = vpop.f32.mrf.mxu1 }
 0x1c0   : > { %v675_v17 = vadd.f32 %v983_v35, %v674_v16  ;;  %1207 = vmatprep.mubr.f32.mxu0 %v695_v13  ;;  %v698_v19 = vmax.f32 %v680_v15, 0.0 }
 0x1c1   : > { %1208 = vmatmul.mubr.f32.gmra.mxu0 %v696_v14 }
 0x1c2   : > { %v697_v18 = vmax.f32 %v675_v17, 0.0 }
 0x1c4   : > { %1210 = vmatprep.mubr.f32.mxu0 %v697_v18 }
 0x1c5   : > { %1211 = vmatmul.mubr.f32.gmra.mxu0 %v698_v19 }
 0x269   : > { %v1191_v21 = vpop.f32.mrf.mxu0 }
 0x26a   : > { %v794_v22 = vadd.f32 %v1191_v21, %v984_v20 }
 0x26b   : > { %v788_v23 = vpop.f32.mrf.mxu0 }
 0x26c   : > { %868 = vst [vmem:[%s1559_s15 + $0x8] sm:$0xff] %v794_v22  ;;  %v789_v24 = vadd.f32 %v984_v20, %v788_v23 }
 0x26d   : > { %v1194_v25 = vpop.f32.mrf.mxu0 }
 0x26e   : > { %867 = vst [vmem:[%s1559_s15] sm:$0xff] %v789_v24  ;;  %v804_v26 = vadd.f32 %v1194_v25, %v984_v20 }
 0x26f   : > { %v798_v27 = vpop.f32.mrf.mxu0 }
 0x270   : > { %870 = vst [vmem:[%s1559_s15 + $0x18] sm:$0xff] %v804_v26  ;;  %v799_v28 = vadd.f32 %v984_v20, %v798_v27 }
 0x271   : > { %v1197_v29 = vpop.f32.mrf.mxu0 }
 0x272   : > { %869 = vst [vmem:[%s1559_s15 + $0x10] sm:$0xff] %v799_v28  ;;  %v814_v30 = vadd.f32 %v1197_v29, %v984_v20 }
 0x273   : > { %v808_v31 = vpop.f32.mrf.mxu0 }
 0x274   : > { %872 = vst [vmem:[%s1559_s15 + $0x28] sm:$0xff] %v814_v30  ;;  %v809_v32 = vadd.f32 %v984_v20, %v808_v31 }
 0x275   : > { %v1200_v33 = vpop.f32.mrf.mxu0 }
 0x276   : > { %871 = vst [vmem:[%s1559_s15 + $0x20] sm:$0xff] %v809_v32  ;;  %v824_v34 = vadd.f32 %v1200_v33, %v984_v20 }
 0x277   : > { %v818_v35 = vpop.f32.mrf.mxu0 }
 0x278   : > { %874 = vst [vmem:[%s1559_s15 + $0x38] sm:$0xff] %v824_v34  ;;  %v819_v36 = vadd.f32 %v984_v20, %v818_v35 }
 0x279   : > { %v1203_v37 = vpop.f32.mrf.mxu0 }
 0x27a   : > { %873 = vst [vmem:[%s1559_s15 + $0x30] sm:$0xff] %v819_v36  ;;  %v834_v38 = vadd.f32 %v1203_v37, %v984_v20 }
 0x27b   : > { %v828_v39 = vpop.f32.mrf.mxu0 }
 0x27c   : > { %876 = vst [vmem:[%s1559_s15 + $0x48] sm:$0xff] %v834_v38  ;;  %v829_v40 = vadd.f32 %v984_v20, %v828_v39 }
 0x27d   : > { %v1206_v41 = vpop.f32.mrf.mxu0 }
 0x27e   : > { %875 = vst [vmem:[%s1559_s15 + $0x40] sm:$0xff] %v829_v40  ;;  %v844_v42 = vadd.f32 %v1206_v41, %v984_v20 }
 0x27f   : > { %v838_v43 = vpop.f32.mrf.mxu0 }
 0x280   : > { %878 = vst [vmem:[%s1559_s15 + $0x58] sm:$0xff] %v844_v42  ;;  %v839_v44 = vadd.f32 %v984_v20, %v838_v43 }
 0x281   : > { %v1209_v45 = vpop.f32.mrf.mxu0 }
 0x282   : > { %877 = vst [vmem:[%s1559_s15 + $0x50] sm:$0xff] %v839_v44  ;;  %v854_v46 = vadd.f32 %v1209_v45, %v984_v20 }
 0x283   : > { %v848_v47 = vpop.f32.mrf.mxu0 }
 0x284   : > { %880 = vst [vmem:[%s1559_s15 + $0x68] sm:$0xff] %v854_v46  ;;  %v849_v48 = vadd.f32 %v984_v20, %v848_v47 }
 0x285   : > { %v1212_v49 = vpop.f32.mrf.mxu0 }
 0x286   : > { %879 = vst [vmem:[%s1559_s15 + $0x60] sm:$0xff] %v849_v48  ;;  %v864_v50 = vadd.f32 %v1212_v49, %v984_v20 }
 0x287   : > { %v858_v51 = vpop.f32.mrf.mxu0 }
 0x288   : > { %882 = vst [vmem:[%s1559_s15 + $0x78] sm:$0xff] %v864_v50  ;;  %v859_v52 = vadd.f32 %v984_v20, %v858_v51 }
 0x28a   : > { %881 = vst [vmem:[%s1559_s15 + $0x70] sm:$0xff] %v859_v52 }
 0x28b   : > { %1267 = shalt.err (!%p1264_p3)
}
 0x28c   : > { %s1268_s21 = scalar_lea.hbm %s1580_s16, 2048  ;;  %s1272_s29 = scalar_lea.hbm %s1635_s7, 4096 }
 0x28d   : > { %p1269_p4 = scmp.ne.s32.totalorder %s1580_s16, %s1268_s21  ;;  %p1273_p9 = scmp.lt.s32.totalorder %s1580_s16, %s1635_s7 }
 0x28e   : > { %p1274_p10 = scmp.lt.s32.totalorder %s1272_s29, %s1268_s21 }
 0x28f   : > { %p1270_p7 = pnand %p1269_p4, %p1397_p5 }
 0x290   : > { %p1275_p11 = por %p1274_p10, %p1273_p9 }
 0x291   : > { %p1271_p8 = pneg %p1270_p7 }
 0x293   : > { %p1276_p12 = pnand %p1275_p11, %p1271_p8 }
 0x295   : > { %1279 = shalt.err (!%p1276_p12)
}
 0x296   : > { %s1317_s13 = smov 128   ;;  %s1318_s14 = smov 8  }
 0x297   : > { %1213 = dma.vmem_to_hbm [thread:$0]  (%p1397_p5), %s1582_s9, 2048, %s1580_s16, %s1588_s28, %s1317_s13, %s1317_s13, %s1318_s14  }
 0x298 PF: > { %p1219_p13 = scmp.ge.s32.totalorder %s1314_s27, 2  ;;  %s912_s18 = sand.u32 1, %s1302_s24  }
 0x299   : > { %s913_s17 = scalar_lea.sflag [#allocation3], %s912_s18 }
 0x29a   : > { %p1216_p0 = pnand %p1219_p13, %p1401_p6 }
 0x29c   : > { %p1217_p1 = pneg %p1216_p0 }
 0x29e   : > { %1297 = dma.done.wait (%p1217_p1), %s913_s17, 2048  }
 0x29f   : > { %1299 = vsyncadd (%p1217_p1), %s913_s17, 4294965248  ;;  %p17_p2 = scmp.ge.s32.totalorder %s1384_s30, 4   ;;  %s1638_s24 = smov %s1306_s25 }
 0x2a0   : > { %s1639_s25 = smov %s1310_s26  ;;  %s1640_s26 = smov %s1395_s10 }
 0x2a1   : > { %s1641_s27 = smov %s1384_s30  ;;  %19 = sbr.rel (!%p17_p2) target bundleno = 3 (0x3), region = 83 }
 0x2a6   :  { %918 = vsyncpa [#allocation3], 1 }
 0x2a7   :  { %920 = vsyncpa [#allocation3 + $0x1], 1 }

</bundles_post_ra>
